<compile_context>
chip_gen: v5e
topology: v5e:2x2
jax: 0.10.0
libtpu: 0.0.40
codegen_flags: <defaults>
</compile_context>

<pallas_src>
import numpy as np
import jax
import jax.numpy as jnp
from jax.experimental import pallas as pl
from jax.experimental.pallas import tpu as pltpu

BN_EPS = 1e-5
LANE = 128
KSIZE = 3
TAPS = KSIZE * KSIZE
STRIDE = 2
PAD = 1


def _round_up(v, m):
    return (v + m - 1) // m * m


def _conv_out(s):
    return (s + 2 * PAD - KSIZE) // STRIDE + 1


# ---------------------------------------------------------------------------
# Fused kernel
# ---------------------------------------------------------------------------
def _conv_relu_bn(x_bf16, w_ref, p_ref):
    """One conv (as a single matmul on pre-gathered patches) + bias + ReLU + BN.

    x_bf16: (R, K)       bf16 patch rows (row = n*H*W + h*W + w)
    w_ref : (K, C_pad)   bf16 weight matrix (taps folded along K)
    p_ref : (3, C_pad)   f32 rows = (bias, gamma, beta)
    returns (R, C_pad) f32
    """
    p = p_ref[...]
    bias, gamma, beta = p[0:1, :], p[1:2, :], p[2:3, :]

    y = jnp.dot(x_bf16, w_ref[...], preferred_element_type=jnp.float32) + bias
    y = jnp.maximum(y, 0.0)                                 # conv bias + ReLU (f32)

    # BatchNorm2d training-mode stats over all rows (= N*H*W); cross-sublane
    # reductions run on the XLU (not the MXU), sum(y) and sum(y*y) in one pass.
    inv_r = 1.0 / x_bf16.shape[0]
    mean = jnp.sum(y, axis=0, keepdims=True) * inv_r
    var = jnp.maximum(jnp.sum(y * y, axis=0, keepdims=True) * inv_r - mean * mean,
                      0.0)
    scale = gamma * jax.lax.rsqrt(var + BN_EPS)             # folded BN -> one FMA
    return y * scale + (beta - mean * scale)


def _fused_kernel(xp_ref, w1_ref, p1_ref,
                  s2_ref, w2_ref, p2_ref,
                  s3_ref, w3_ref, p3_ref,
                  s4_ref, w4_ref, p4_ref,
                  o_ref):
    # Layer 1: im2col was done host-side -> a single (128,128)x(128,128) matmul.
    a = _conv_relu_bn(xp_ref[...], w1_ref, p1_ref)

    # Layers 2-4: one tap-stacked gather matmul + one long-K weight matmul each.
    for s_ref, w_ref, p_ref in ((s2_ref, w2_ref, p2_ref),
                                (s3_ref, w3_ref, p3_ref),
                                (s4_ref, w4_ref, p4_ref)):
        r_out = s_ref.shape[0] // TAPS
        # 0/1 row-selection on the MXU; all-zero rows implement the zero padding.
        # f32 result is an exact copy of the selected bf16 activations.
        g_all = jnp.dot(s_ref[...], a.astype(jnp.bfloat16),
                        preferred_element_type=jnp.float32)
        # Re-lay the 9 taps along lanes: (9*R_out, Cin_pad) -> (R_out, 9*Cin_pad).
        g_cat = jnp.concatenate(
            [g_all[t * r_out:(t + 1) * r_out, :] for t in range(TAPS)], axis=1)
        # Exact cast (values already bf16-representable) -> single K=9*128 matmul.
        a = _conv_relu_bn(g_cat.astype(jnp.bfloat16), w_ref, p_ref)

    o_ref[...] = a                                          # (2, 256) f32, lane-dense


# ---------------------------------------------------------------------------
# Host-side (static) packing: gather matrices + padded weights/params
# ---------------------------------------------------------------------------
def _gather_rows(n, hi, wi):
    """Tap-stacked 0/1 gather matrix: rows ordered (tap, out_row)."""
    ho, wo = _conv_out(hi), _conv_out(wi)
    r_in, r_out = n * hi * wi, n * ho * wo
    s = np.zeros((TAPS * r_out, r_in), np.float32)
    for ki in range(KSIZE):
        for kj in range(KSIZE):
            t = ki * KSIZE + kj
            for b in range(n):
                for oh in range(ho):
                    ih = STRIDE * oh + ki - PAD
                    if not 0 <= ih < hi:
                        continue
                    for ow in range(wo):
                        iw = STRIDE * ow + kj - PAD
                        if not 0 <= iw < wi:
                            continue
                        s[t * r_out + (b * ho + oh) * wo + ow,
                          (b * hi + ih) * wi + iw] = 1.0
    return s, ho, wo


def _pack_bn(bias, gamma, beta, c_pad):
    p = np.zeros((3, c_pad), np.float32)
    c = np.asarray(bias).shape[0]
    p[0, :c] = np.asarray(bias, np.float32)
    p[1, :c] = np.asarray(gamma, np.float32)
    p[2, :c] = np.asarray(beta, np.float32)
    return p


def prepare_model(params, n, h, w):
    """Pack weights channel-padded/bf16 and build tap-stacked gather matrices."""
    # ---- layer 1: taps folded along K (matches host-side im2col column order)
    wt1, b1, g1, be1 = params[0]
    c_out1, c_in1 = wt1.shape[0], wt1.shape[1]
    k1_pad = _round_up(TAPS * c_in1, LANE)
    c_out1_pad = _round_up(c_out1, LANE)
    w1 = np.zeros((k1_pad, c_out1_pad), np.float32)
    wt1_np = np.asarray(wt1, np.float32)
    for ki in range(KSIZE):
        for kj in range(KSIZE):
            t = ki * KSIZE + kj
            w1[t * c_in1:(t + 1) * c_in1, :c_out1] = wt1_np[:, :, ki, kj].T
    layer1 = (jnp.asarray(w1, jnp.bfloat16),
              jnp.asarray(_pack_bn(b1, g1, be1, c_out1_pad), jnp.float32))

    # ---- layers 2-4: tap-stacked S + taps concatenated along the K axis of W
    layers = []
    hi, wi = _conv_out(h), _conv_out(w)
    c_in_pad = c_out1_pad
    for (wt, b, gamma, beta) in params[1:]:
        c_out, c_in = wt.shape[0], wt.shape[1]
        c_out_pad = _round_up(c_out, LANE)
        s, ho, wo = _gather_rows(n, hi, wi)

        wcat = np.zeros((TAPS * c_in_pad, c_out_pad), np.float32)
        wt_np = np.asarray(wt, np.float32)
        for ki in range(KSIZE):
            for kj in range(KSIZE):
                t = ki * KSIZE + kj
                wcat[t * c_in_pad:t * c_in_pad + c_in, :c_out] = wt_np[:, :, ki, kj].T

        layers.append((jnp.asarray(s, jnp.bfloat16),
                       jnp.asarray(wcat, jnp.bfloat16),
                       jnp.asarray(_pack_bn(b, gamma, beta, c_out_pad), jnp.float32)))
        hi, wi, c_in_pad = ho, wo, c_out_pad
    return layer1, layers


# ---------------------------------------------------------------------------
# Model wrapper
# ---------------------------------------------------------------------------
def _im2col_layer1(x_nchw, k_pad):
    """Boundary-side im2col for layer 1: (N,C,H,W) -> (N*H1*W1, 9*C -> k_pad) bf16."""
    n, c, h, w = x_nchw.shape
    ho, wo = _conv_out(h), _conv_out(w)
    x_nhwc = jnp.transpose(x_nchw, (0, 2, 3, 1))
    x_pad = jnp.pad(x_nhwc, ((0, 0), (PAD, PAD), (PAD, PAD), (0, 0)))
    taps = []
    for ki in range(KSIZE):
        for kj in range(KSIZE):
            taps.append(x_pad[:, ki:ki + STRIDE * ho:STRIDE,
                              kj:kj + STRIDE * wo:STRIDE, :])
    patches = jnp.concatenate(taps, axis=-1).reshape(n * ho * wo, TAPS * c)
    patches = jnp.pad(patches, ((0, 0), (0, k_pad - TAPS * c)))
    return patches.astype(jnp.bfloat16)


@jax.jit
def bigger_conv_input_model(x_nchw, layer1, layers):
    n = x_nchw.shape[0]
    w1, p1 = layer1
    xp = _im2col_layer1(x_nchw, w1.shape[0])

    r_out = layers[-1][0].shape[0] // TAPS
    c_out = layers[-1][1].shape[1]

    args = [xp, w1, p1]
    for lyr in layers:
        args.extend(lyr)

    # Advisory cost estimate for XLA's scheduler (latency-bound pipeline).
    flops = 2 * xp.shape[0] * xp.shape[1] * w1.shape[1] + 10 * xp.shape[0] * w1.shape[1]
    transcendentals = w1.shape[1]
    bytes_accessed = xp.size * 2 + w1.size * 2 + p1.size * 4 + r_out * c_out * 4
    a_cols = w1.shape[1]
    for (s, wcat, p) in layers:
        r9, r_in = s.shape
        k, co = wcat.shape
        ro = r9 // TAPS
        flops += 2 * r9 * r_in * a_cols + 2 * ro * k * co + 10 * ro * co
        transcendentals += co
        bytes_accessed += s.size * 2 + wcat.size * 2 + p.size * 4
        a_cols = co

    out2d = pl.pallas_call(
        _fused_kernel,
        out_shape=jax.ShapeDtypeStruct((r_out, c_out), jnp.float32),
        in_specs=[pl.BlockSpec(memory_space=pltpu.MemorySpace.VMEM)] * len(args),
        out_specs=pl.BlockSpec(memory_space=pltpu.MemorySpace.VMEM),
        compiler_params=pltpu.CompilerParams(vmem_limit_bytes=32 * 1024 * 1024),
        cost_estimate=pl.CostEstimate(flops=flops,
                                      transcendentals=transcendentals,
                                      bytes_accessed=bytes_accessed),
    )(*args)

    hf, wf = x_nchw.shape[2], x_nchw.shape[3]
    for _ in range(len(layers) + 1):
        hf, wf = _conv_out(hf), _conv_out(wf)
    out = out2d.reshape(n, hf, wf, c_out)
    return jnp.transpose(out, (0, 3, 1, 2))      # back to NCHW at the boundary only


# ---------------------------------------------------------------------------
# Pure-JAX reference (same bf16-in / f32-accum precision as the kernel)
# ---------------------------------------------------------------------------
@jax.jit
def _reference_forward(x, params):
    a = x
    for (wt, b, gamma, beta) in params:
        y = jax.lax.conv_general_dilated(
            a.astype(jnp.bfloat16), wt.astype(jnp.bfloat16),
            window_strides=(STRIDE, STRIDE), padding=((PAD, PAD), (PAD, PAD)),
            dimension_numbers=("NCHW", "OIHW", "NCHW"),
            preferred_element_type=jnp.float32)
        y = jnp.maximum(y + b[None, :, None, None], 0.0)
        mean = jnp.mean(y, axis=(0, 2, 3), keepdims=True)
        var = jnp.mean((y - mean) ** 2, axis=(0, 2, 3), keepdims=True)
        a = ((y - mean) * jax.lax.rsqrt(var + BN_EPS)
             * gamma[None, :, None, None] + beta[None, :, None, None])
    return a


# ---------------------------------------------------------------------------
# Params (PyTorch-like init) and demo
# ---------------------------------------------------------------------------
def init_params(key):
    layer_dims = [(32, 3), (64, 32), (128, 64), (256, 128)]
    params = []
    for i, (c_out, c_in) in enumerate(layer_dims):
        kw_key, kb_key = jax.random.split(jax.random.fold_in(key, i))
        bound = 1.0 / float(np.sqrt(c_in * KSIZE * KSIZE))
        wt = jax.random.uniform(kw_key, (c_out, c_in, KSIZE, KSIZE),
                                minval=-bound, maxval=bound, dtype=jnp.float32)
        b = jax.random.uniform(kb_key, (c_out,),
                               minval=-bound, maxval=bound, dtype=jnp.float32)
        gamma = jnp.ones((c_out,), jnp.float32)   # BatchNorm2d defaults
        beta = jnp.zeros((c_out,), jnp.float32)
        params.append((wt, b, gamma, beta))
    return params


if __name__ == "__main__":
    key = jax.random.PRNGKey(0)
    x_key, p_key = jax.random.split(key)
    # img: (N=2, C=3, H=16, W=16), NCHW as in PyTorch
    x = jax.random.normal(x_key, (2, 3, 16, 16), dtype=jnp.float32)
    params = init_params(p_key)
    layer1, layers = prepare_model(params, n=2, h=16, w=16)

    out = bigger_conv_input_model(x, layer1, layers)
    out = jax.block_until_ready(out)

    expected_shape = (2, 256, 1, 1)
    assert out.shape == expected_shape, (out.shape, expected_shape)
    assert bool(jnp.all(jnp.isfinite(out)))

    # Loose check vs a same-precision JAX reference (BN over 2 rows in layer 4
    # amplifies tiny accumulation-order differences, so compare mean error).
    ref = _reference_forward(x, params)
    mean_err = float(jnp.mean(jnp.abs(out - ref)))
    assert mean_err < 0.1, mean_err

    print("KERNEL_OK")
</pallas_src>

<mosaic_0001>
module attributes {stable_mosaic.version = 11 : i64} {
  func.func @_fused_kernel(%arg0: memref<128x128xbf16, #tpu.memory_space<vmem>>, %arg1: memref<128x128xbf16, #tpu.memory_space<vmem>>, %arg2: memref<3x128xf32, #tpu.memory_space<vmem>>, %arg3: memref<288x128xbf16, #tpu.memory_space<vmem>>, %arg4: memref<1152x128xbf16, #tpu.memory_space<vmem>>, %arg5: memref<3x128xf32, #tpu.memory_space<vmem>>, %arg6: memref<72x32xbf16, #tpu.memory_space<vmem>>, %arg7: memref<1152x128xbf16, #tpu.memory_space<vmem>>, %arg8: memref<3x128xf32, #tpu.memory_space<vmem>>, %arg9: memref<18x8xbf16, #tpu.memory_space<vmem>>, %arg10: memref<1152x256xbf16, #tpu.memory_space<vmem>>, %arg11: memref<3x256xf32, #tpu.memory_space<vmem>>, %arg12: memref<2x256xf32, #tpu.memory_space<vmem>>) attributes {dimension_semantics = [], scalar_prefetch = 0 : i64, scratch_operands = 0 : i64, tpu.core_type = #tpu.core_type<tc>} {
    %c0 = arith.constant 0 : index
    %c0_0 = arith.constant 0 : index
    %0 = vector.load %arg0[%c0, %c0_0] : memref<128x128xbf16, #tpu.memory_space<vmem>>, vector<128x128xbf16>
    %c0_1 = arith.constant 0 : index
    %c0_2 = arith.constant 0 : index
    %1 = vector.load %arg2[%c0_1, %c0_2] : memref<3x128xf32, #tpu.memory_space<vmem>>, vector<3x128xf32>
    %2 = vector.extract_strided_slice %1 {offsets = [0, 0], sizes = [1, 128], strides = [1, 1]} : vector<3x128xf32> to vector<1x128xf32>
    %3 = vector.extract_strided_slice %1 {offsets = [1, 0], sizes = [1, 128], strides = [1, 1]} : vector<3x128xf32> to vector<1x128xf32>
    %4 = vector.extract_strided_slice %1 {offsets = [2, 0], sizes = [1, 128], strides = [1, 1]} : vector<3x128xf32> to vector<1x128xf32>
    %c0_3 = arith.constant 0 : index
    %c0_4 = arith.constant 0 : index
    %5 = vector.load %arg1[%c0_3, %c0_4] : memref<128x128xbf16, #tpu.memory_space<vmem>>, vector<128x128xbf16>
    %cst = arith.constant dense<0.000000e+00> : vector<128x128xf32>
    %6 = tpu.matmul %0, %5, %cst {dimension_numbers = #tpu.dot_dimension_numbers<[1], [0], [0], [1], [0, 0, 1, 1], [], []>} : vector<128x128xbf16>, vector<128x128xbf16>, vector<128x128xf32> -> vector<128x128xf32>
    %7 = vector.broadcast %2 : vector<1x128xf32> to vector<128x128xf32>
    %8 = arith.addf %6, %7 : vector<128x128xf32>
    %cst_5 = arith.constant 0.000000e+00 : f32
    %9 = vector.broadcast %cst_5 : f32 to vector<128x128xf32>
    %10 = arith.maximumf %8, %9 : vector<128x128xf32>
    %cst_6 = arith.constant dense<0.000000e+00> : vector<128xf32>
    %11 = vector.multi_reduction <add>, %10, %cst_6 [0] : vector<128x128xf32> to vector<128xf32>
    %12 = vector.shape_cast %11 : vector<128xf32> to vector<1x128xf32>
    %cst_7 = arith.constant 7.812500e-03 : f32
    %13 = vector.broadcast %cst_7 : f32 to vector<1x128xf32>
    %14 = arith.mulf %12, %13 : vector<1x128xf32>
    %15 = arith.mulf %10, %10 : vector<128x128xf32>
    %cst_8 = arith.constant dense<0.000000e+00> : vector<128xf32>
    %16 = vector.multi_reduction <add>, %15, %cst_8 [0] : vector<128x128xf32> to vector<128xf32>
    %17 = vector.shape_cast %16 : vector<128xf32> to vector<1x128xf32>
    %cst_9 = arith.constant 7.812500e-03 : f32
    %18 = vector.broadcast %cst_9 : f32 to vector<1x128xf32>
    %19 = arith.mulf %17, %18 : vector<1x128xf32>
    %20 = arith.mulf %14, %14 : vector<1x128xf32>
    %21 = arith.subf %19, %20 : vector<1x128xf32>
    %cst_10 = arith.constant 0.000000e+00 : f32
    %22 = vector.broadcast %cst_10 : f32 to vector<1x128xf32>
    %23 = arith.maximumf %21, %22 : vector<1x128xf32>
    %cst_11 = arith.constant 9.99999974E-6 : f32
    %24 = vector.broadcast %cst_11 : f32 to vector<1x128xf32>
    %25 = arith.addf %23, %24 : vector<1x128xf32>
    %26 = math.rsqrt %25 : vector<1x128xf32>
    %27 = arith.mulf %3, %26 : vector<1x128xf32>
    %28 = vector.broadcast %27 : vector<1x128xf32> to vector<128x128xf32>
    %29 = arith.mulf %10, %28 : vector<128x128xf32>
    %30 = arith.mulf %14, %27 : vector<1x128xf32>
    %31 = arith.subf %4, %30 : vector<1x128xf32>
    %32 = vector.broadcast %31 : vector<1x128xf32> to vector<128x128xf32>
    %33 = arith.addf %29, %32 : vector<128x128xf32>
    %c0_12 = arith.constant 0 : index
    %c0_13 = arith.constant 0 : index
    %34 = vector.load %arg3[%c0_12, %c0_13] : memref<288x128xbf16, #tpu.memory_space<vmem>>, vector<288x128xbf16>
    %35 = arith.truncf %33 : vector<128x128xf32> to vector<128x128xbf16>
    %cst_14 = arith.constant dense<0.000000e+00> : vector<288x128xf32>
    %36 = tpu.matmul %34, %35, %cst_14 {dimension_numbers = #tpu.dot_dimension_numbers<[1], [0], [0], [1], [0, 0, 1, 1], [], []>} : vector<288x128xbf16>, vector<128x128xbf16>, vector<288x128xf32> -> vector<288x128xf32>
    %37 = vector.extract_strided_slice %36 {offsets = [0, 0], sizes = [32, 128], strides = [1, 1]} : vector<288x128xf32> to vector<32x128xf32>
    %38 = vector.extract_strided_slice %36 {offsets = [32, 0], sizes = [32, 128], strides = [1, 1]} : vector<288x128xf32> to vector<32x128xf32>
    %39 = vector.extract_strided_slice %36 {offsets = [64, 0], sizes = [32, 128], strides = [1, 1]} : vector<288x128xf32> to vector<32x128xf32>
    %40 = vector.extract_strided_slice %36 {offsets = [96, 0], sizes = [32, 128], strides = [1, 1]} : vector<288x128xf32> to vector<32x128xf32>
    %41 = vector.extract_strided_slice %36 {offsets = [128, 0], sizes = [32, 128], strides = [1, 1]} : vector<288x128xf32> to vector<32x128xf32>
    %42 = vector.extract_strided_slice %36 {offsets = [160, 0], sizes = [32, 128], strides = [1, 1]} : vector<288x128xf32> to vector<32x128xf32>
    %43 = vector.extract_strided_slice %36 {offsets = [192, 0], sizes = [32, 128], strides = [1, 1]} : vector<288x128xf32> to vector<32x128xf32>
    %44 = vector.extract_strided_slice %36 {offsets = [224, 0], sizes = [32, 128], strides = [1, 1]} : vector<288x128xf32> to vector<32x128xf32>
    %45 = vector.extract_strided_slice %36 {offsets = [256, 0], sizes = [32, 128], strides = [1, 1]} : vector<288x128xf32> to vector<32x128xf32>
    %46 = tpu.concatenate %37, %38, %39, %40, %41, %42, %43, %44, %45 in 1 : vector<32x128xf32>, vector<32x128xf32>, vector<32x128xf32>, vector<32x128xf32>, vector<32x128xf32>, vector<32x128xf32>, vector<32x128xf32>, vector<32x128xf32>, vector<32x128xf32> -> vector<32x1152xf32>
    %47 = arith.truncf %46 : vector<32x1152xf32> to vector<32x1152xbf16>
    %c0_15 = arith.constant 0 : index
    %c0_16 = arith.constant 0 : index
    %48 = vector.load %arg5[%c0_15, %c0_16] : memref<3x128xf32, #tpu.memory_space<vmem>>, vector<3x128xf32>
    %49 = vector.extract_strided_slice %48 {offsets = [0, 0], sizes = [1, 128], strides = [1, 1]} : vector<3x128xf32> to vector<1x128xf32>
    %50 = vector.extract_strided_slice %48 {offsets = [1, 0], sizes = [1, 128], strides = [1, 1]} : vector<3x128xf32> to vector<1x128xf32>
    %51 = vector.extract_strided_slice %48 {offsets = [2, 0], sizes = [1, 128], strides = [1, 1]} : vector<3x128xf32> to vector<1x128xf32>
    %c0_17 = arith.constant 0 : index
    %c0_18 = arith.constant 0 : index
    %52 = vector.load %arg4[%c0_17, %c0_18] : memref<1152x128xbf16, #tpu.memory_space<vmem>>, vector<1152x128xbf16>
    %cst_19 = arith.constant dense<0.000000e+00> : vector<32x128xf32>
    %53 = tpu.matmul %47, %52, %cst_19 {dimension_numbers = #tpu.dot_dimension_numbers<[1], [0], [0], [1], [0, 0, 1, 1], [], []>} : vector<32x1152xbf16>, vector<1152x128xbf16>, vector<32x128xf32> -> vector<32x128xf32>
    %54 = vector.broadcast %49 : vector<1x128xf32> to vector<32x128xf32>
    %55 = arith.addf %53, %54 : vector<32x128xf32>
    %cst_20 = arith.constant 0.000000e+00 : f32
    %56 = vector.broadcast %cst_20 : f32 to vector<32x128xf32>
    %57 = arith.maximumf %55, %56 : vector<32x128xf32>
    %cst_21 = arith.constant dense<0.000000e+00> : vector<128xf32>
    %58 = vector.multi_reduction <add>, %57, %cst_21 [0] : vector<32x128xf32> to vector<128xf32>
    %59 = vector.shape_cast %58 : vector<128xf32> to vector<1x128xf32>
    %cst_22 = arith.constant 3.125000e-02 : f32
    %60 = vector.broadcast %cst_22 : f32 to vector<1x128xf32>
    %61 = arith.mulf %59, %60 : vector<1x128xf32>
    %62 = arith.mulf %57, %57 : vector<32x128xf32>
    %cst_23 = arith.constant dense<0.000000e+00> : vector<128xf32>
    %63 = vector.multi_reduction <add>, %62, %cst_23 [0] : vector<32x128xf32> to vector<128xf32>
    %64 = vector.shape_cast %63 : vector<128xf32> to vector<1x128xf32>
    %cst_24 = arith.constant 3.125000e-02 : f32
    %65 = vector.broadcast %cst_24 : f32 to vector<1x128xf32>
    %66 = arith.mulf %64, %65 : vector<1x128xf32>
    %67 = arith.mulf %61, %61 : vector<1x128xf32>
    %68 = arith.subf %66, %67 : vector<1x128xf32>
    %cst_25 = arith.constant 0.000000e+00 : f32
    %69 = vector.broadcast %cst_25 : f32 to vector<1x128xf32>
    %70 = arith.maximumf %68, %69 : vector<1x128xf32>
    %cst_26 = arith.constant 9.99999974E-6 : f32
    %71 = vector.broadcast %cst_26 : f32 to vector<1x128xf32>
    %72 = arith.addf %70, %71 : vector<1x128xf32>
    %73 = math.rsqrt %72 : vector<1x128xf32>
    %74 = arith.mulf %50, %73 : vector<1x128xf32>
    %75 = vector.broadcast %74 : vector<1x128xf32> to vector<32x128xf32>
    %76 = arith.mulf %57, %75 : vector<32x128xf32>
    %77 = arith.mulf %61, %74 : vector<1x128xf32>
    %78 = arith.subf %51, %77 : vector<1x128xf32>
    %79 = vector.broadcast %78 : vector<1x128xf32> to vector<32x128xf32>
    %80 = arith.addf %76, %79 : vector<32x128xf32>
    %c0_27 = arith.constant 0 : index
    %c0_28 = arith.constant 0 : index
    %81 = vector.load %arg6[%c0_27, %c0_28] : memref<72x32xbf16, #tpu.memory_space<vmem>>, vector<72x32xbf16>
    %82 = arith.truncf %80 : vector<32x128xf32> to vector<32x128xbf16>
    %cst_29 = arith.constant dense<0.000000e+00> : vector<72x128xf32>
    %83 = tpu.matmul %81, %82, %cst_29 {dimension_numbers = #tpu.dot_dimension_numbers<[1], [0], [0], [1], [0, 0, 1, 1], [], []>} : vector<72x32xbf16>, vector<32x128xbf16>, vector<72x128xf32> -> vector<72x128xf32>
    %84 = vector.extract_strided_slice %83 {offsets = [0, 0], sizes = [8, 128], strides = [1, 1]} : vector<72x128xf32> to vector<8x128xf32>
    %85 = vector.extract_strided_slice %83 {offsets = [8, 0], sizes = [8, 128], strides = [1, 1]} : vector<72x128xf32> to vector<8x128xf32>
    %86 = vector.extract_strided_slice %83 {offsets = [16, 0], sizes = [8, 128], strides = [1, 1]} : vector<72x128xf32> to vector<8x128xf32>
    %87 = vector.extract_strided_slice %83 {offsets = [24, 0], sizes = [8, 128], strides = [1, 1]} : vector<72x128xf32> to vector<8x128xf32>
    %88 = vector.extract_strided_slice %83 {offsets = [32, 0], sizes = [8, 128], strides = [1, 1]} : vector<72x128xf32> to vector<8x128xf32>
    %89 = vector.extract_strided_slice %83 {offsets = [40, 0], sizes = [8, 128], strides = [1, 1]} : vector<72x128xf32> to vector<8x128xf32>
    %90 = vector.extract_strided_slice %83 {offsets = [48, 0], sizes = [8, 128], strides = [1, 1]} : vector<72x128xf32> to vector<8x128xf32>
    %91 = vector.extract_strided_slice %83 {offsets = [56, 0], sizes = [8, 128], strides = [1, 1]} : vector<72x128xf32> to vector<8x128xf32>
    %92 = vector.extract_strided_slice %83 {offsets = [64, 0], sizes = [8, 128], strides = [1, 1]} : vector<72x128xf32> to vector<8x128xf32>
    %93 = tpu.concatenate %84, %85, %86, %87, %88, %89, %90, %91, %92 in 1 : vector<8x128xf32>, vector<8x128xf32>, vector<8x128xf32>, vector<8x128xf32>, vector<8x128xf32>, vector<8x128xf32>, vector<8x128xf32>, vector<8x128xf32>, vector<8x128xf32> -> vector<8x1152xf32>
    %94 = arith.truncf %93 : vector<8x1152xf32> to vector<8x1152xbf16>
    %c0_30 = arith.constant 0 : index
    %c0_31 = arith.constant 0 : index
    %95 = vector.load %arg8[%c0_30, %c0_31] : memref<3x128xf32, #tpu.memory_space<vmem>>, vector<3x128xf32>
    %96 = vector.extract_strided_slice %95 {offsets = [0, 0], sizes = [1, 128], strides = [1, 1]} : vector<3x128xf32> to vector<1x128xf32>
    %97 = vector.extract_strided_slice %95 {offsets = [1, 0], sizes = [1, 128], strides = [1, 1]} : vector<3x128xf32> to vector<1x128xf32>
    %98 = vector.extract_strided_slice %95 {offsets = [2, 0], sizes = [1, 128], strides = [1, 1]} : vector<3x128xf32> to vector<1x128xf32>
    %c0_32 = arith.constant 0 : index
    %c0_33 = arith.constant 0 : index
    %99 = vector.load %arg7[%c0_32, %c0_33] : memref<1152x128xbf16, #tpu.memory_space<vmem>>, vector<1152x128xbf16>
    %cst_34 = arith.constant dense<0.000000e+00> : vector<8x128xf32>
    %100 = tpu.matmul %94, %99, %cst_34 {dimension_numbers = #tpu.dot_dimension_numbers<[1], [0], [0], [1], [0, 0, 1, 1], [], []>} : vector<8x1152xbf16>, vector<1152x128xbf16>, vector<8x128xf32> -> vector<8x128xf32>
    %101 = vector.broadcast %96 : vector<1x128xf32> to vector<8x128xf32>
    %102 = arith.addf %100, %101 : vector<8x128xf32>
    %cst_35 = arith.constant 0.000000e+00 : f32
    %103 = vector.broadcast %cst_35 : f32 to vector<8x128xf32>
    %104 = arith.maximumf %102, %103 : vector<8x128xf32>
    %cst_36 = arith.constant dense<0.000000e+00> : vector<128xf32>
    %105 = vector.multi_reduction <add>, %104, %cst_36 [0] : vector<8x128xf32> to vector<128xf32>
    %106 = vector.shape_cast %105 : vector<128xf32> to vector<1x128xf32>
    %cst_37 = arith.constant 1.250000e-01 : f32
    %107 = vector.broadcast %cst_37 : f32 to vector<1x128xf32>
    %108 = arith.mulf %106, %107 : vector<1x128xf32>
    %109 = arith.mulf %104, %104 : vector<8x128xf32>
    %cst_38 = arith.constant dense<0.000000e+00> : vector<128xf32>
    %110 = vector.multi_reduction <add>, %109, %cst_38 [0] : vector<8x128xf32> to vector<128xf32>
    %111 = vector.shape_cast %110 : vector<128xf32> to vector<1x128xf32>
    %cst_39 = arith.constant 1.250000e-01 : f32
    %112 = vector.broadcast %cst_39 : f32 to vector<1x128xf32>
    %113 = arith.mulf %111, %112 : vector<1x128xf32>
    %114 = arith.mulf %108, %108 : vector<1x128xf32>
    %115 = arith.subf %113, %114 : vector<1x128xf32>
    %cst_40 = arith.constant 0.000000e+00 : f32
    %116 = vector.broadcast %cst_40 : f32 to vector<1x128xf32>
    %117 = arith.maximumf %115, %116 : vector<1x128xf32>
    %cst_41 = arith.constant 9.99999974E-6 : f32
    %118 = vector.broadcast %cst_41 : f32 to vector<1x128xf32>
    %119 = arith.addf %117, %118 : vector<1x128xf32>
    %120 = math.rsqrt %119 : vector<1x128xf32>
    %121 = arith.mulf %97, %120 : vector<1x128xf32>
    %122 = vector.broadcast %121 : vector<1x128xf32> to vector<8x128xf32>
    %123 = arith.mulf %104, %122 : vector<8x128xf32>
    %124 = arith.mulf %108, %121 : vector<1x128xf32>
    %125 = arith.subf %98, %124 : vector<1x128xf32>
    %126 = vector.broadcast %125 : vector<1x128xf32> to vector<8x128xf32>
    %127 = arith.addf %123, %126 : vector<8x128xf32>
    %c0_42 = arith.constant 0 : index
    %c0_43 = arith.constant 0 : index
    %128 = vector.load %arg9[%c0_42, %c0_43] : memref<18x8xbf16, #tpu.memory_space<vmem>>, vector<18x8xbf16>
    %129 = arith.truncf %127 : vector<8x128xf32> to vector<8x128xbf16>
    %cst_44 = arith.constant dense<0.000000e+00> : vector<18x128xf32>
    %130 = tpu.matmul %128, %129, %cst_44 {dimension_numbers = #tpu.dot_dimension_numbers<[1], [0], [0], [1], [0, 0, 1, 1], [], []>} : vector<18x8xbf16>, vector<8x128xbf16>, vector<18x128xf32> -> vector<18x128xf32>
    %131 = vector.extract_strided_slice %130 {offsets = [0, 0], sizes = [2, 128], strides = [1, 1]} : vector<18x128xf32> to vector<2x128xf32>
    %132 = vector.extract_strided_slice %130 {offsets = [2, 0], sizes = [2, 128], strides = [1, 1]} : vector<18x128xf32> to vector<2x128xf32>
    %133 = vector.extract_strided_slice %130 {offsets = [4, 0], sizes = [2, 128], strides = [1, 1]} : vector<18x128xf32> to vector<2x128xf32>
    %134 = vector.extract_strided_slice %130 {offsets = [6, 0], sizes = [2, 128], strides = [1, 1]} : vector<18x128xf32> to vector<2x128xf32>
    %135 = vector.extract_strided_slice %130 {offsets = [8, 0], sizes = [2, 128], strides = [1, 1]} : vector<18x128xf32> to vector<2x128xf32>
    %136 = vector.extract_strided_slice %130 {offsets = [10, 0], sizes = [2, 128], strides = [1, 1]} : vector<18x128xf32> to vector<2x128xf32>
    %137 = vector.extract_strided_slice %130 {offsets = [12, 0], sizes = [2, 128], strides = [1, 1]} : vector<18x128xf32> to vector<2x128xf32>
    %138 = vector.extract_strided_slice %130 {offsets = [14, 0], sizes = [2, 128], strides = [1, 1]} : vector<18x128xf32> to vector<2x128xf32>
    %139 = vector.extract_strided_slice %130 {offsets = [16, 0], sizes = [2, 128], strides = [1, 1]} : vector<18x128xf32> to vector<2x128xf32>
    %140 = tpu.concatenate %131, %132, %133, %134, %135, %136, %137, %138, %139 in 1 : vector<2x128xf32>, vector<2x128xf32>, vector<2x128xf32>, vector<2x128xf32>, vector<2x128xf32>, vector<2x128xf32>, vector<2x128xf32>, vector<2x128xf32>, vector<2x128xf32> -> vector<2x1152xf32>
    %141 = arith.truncf %140 : vector<2x1152xf32> to vector<2x1152xbf16>
    %c0_45 = arith.constant 0 : index
    %c0_46 = arith.constant 0 : index
    %142 = vector.load %arg11[%c0_45, %c0_46] : memref<3x256xf32, #tpu.memory_space<vmem>>, vector<3x256xf32>
    %143 = vector.extract_strided_slice %142 {offsets = [0, 0], sizes = [1, 256], strides = [1, 1]} : vector<3x256xf32> to vector<1x256xf32>
    %144 = vector.extract_strided_slice %142 {offsets = [1, 0], sizes = [1, 256], strides = [1, 1]} : vector<3x256xf32> to vector<1x256xf32>
    %145 = vector.extract_strided_slice %142 {offsets = [2, 0], sizes = [1, 256], strides = [1, 1]} : vector<3x256xf32> to vector<1x256xf32>
    %c0_47 = arith.constant 0 : index
    %c0_48 = arith.constant 0 : index
    %146 = vector.load %arg10[%c0_47, %c0_48] : memref<1152x256xbf16, #tpu.memory_space<vmem>>, vector<1152x256xbf16>
    %cst_49 = arith.constant dense<0.000000e+00> : vector<2x256xf32>
    %147 = tpu.matmul %141, %146, %cst_49 {dimension_numbers = #tpu.dot_dimension_numbers<[1], [0], [0], [1], [0, 0, 1, 1], [], []>} : vector<2x1152xbf16>, vector<1152x256xbf16>, vector<2x256xf32> -> vector<2x256xf32>
    %148 = vector.broadcast %143 : vector<1x256xf32> to vector<2x256xf32>
    %149 = arith.addf %147, %148 : vector<2x256xf32>
    %cst_50 = arith.constant 0.000000e+00 : f32
    %150 = vector.broadcast %cst_50 : f32 to vector<2x256xf32>
    %151 = arith.maximumf %149, %150 : vector<2x256xf32>
    %cst_51 = arith.constant dense<0.000000e+00> : vector<256xf32>
    %152 = vector.multi_reduction <add>, %151, %cst_51 [0] : vector<2x256xf32> to vector<256xf32>
    %153 = vector.shape_cast %152 : vector<256xf32> to vector<1x256xf32>
    %cst_52 = arith.constant 5.000000e-01 : f32
    %154 = vector.broadcast %cst_52 : f32 to vector<1x256xf32>
    %155 = arith.mulf %153, %154 : vector<1x256xf32>
    %156 = arith.mulf %151, %151 : vector<2x256xf32>
    %cst_53 = arith.constant dense<0.000000e+00> : vector<256xf32>
    %157 = vector.multi_reduction <add>, %156, %cst_53 [0] : vector<2x256xf32> to vector<256xf32>
    %158 = vector.shape_cast %157 : vector<256xf32> to vector<1x256xf32>
    %cst_54 = arith.constant 5.000000e-01 : f32
    %159 = vector.broadcast %cst_54 : f32 to vector<1x256xf32>
    %160 = arith.mulf %158, %159 : vector<1x256xf32>
    %161 = arith.mulf %155, %155 : vector<1x256xf32>
    %162 = arith.subf %160, %161 : vector<1x256xf32>
    %cst_55 = arith.constant 0.000000e+00 : f32
    %163 = vector.broadcast %cst_55 : f32 to vector<1x256xf32>
    %164 = arith.maximumf %162, %163 : vector<1x256xf32>
    %cst_56 = arith.constant 9.99999974E-6 : f32
    %165 = vector.broadcast %cst_56 : f32 to vector<1x256xf32>
    %166 = arith.addf %164, %165 : vector<1x256xf32>
    %167 = math.rsqrt %166 : vector<1x256xf32>
    %168 = arith.mulf %144, %167 : vector<1x256xf32>
    %169 = vector.broadcast %168 : vector<1x256xf32> to vector<2x256xf32>
    %170 = arith.mulf %151, %169 : vector<2x256xf32>
    %171 = arith.mulf %155, %168 : vector<1x256xf32>
    %172 = arith.subf %145, %171 : vector<1x256xf32>
    %173 = vector.broadcast %172 : vector<1x256xf32> to vector<2x256xf32>
    %174 = arith.addf %170, %173 : vector<2x256xf32>
    %c0_57 = arith.constant 0 : index
    %c0_58 = arith.constant 0 : index
    %175 = vector.load %arg12[%c0_57, %c0_58] : memref<2x256xf32, #tpu.memory_space<vmem>>, vector<2x256xf32>
    tpu.vector_store %arg12[%c0_57, %c0_58], %174 {strides = array<i32>} : memref<2x256xf32, #tpu.memory_space<vmem>>, vector<2x256xf32>,
    return
  }
}

</mosaic_0001>

<bundles_post_ra>
// kernel: bigger_conv_input_model.1
= control target key start
LH: loop header
LB: loop body
LE: loop exit
PB: predicated region body
PF: predicated region fallthrough
CT: control target
= control target key end

     0   :  { %vm1461_vm6 = vcmask 261120   ;;  %vm2273_vm10 = vcmask 1043456   ;;  %vm2266_vm11 = vcmask 64512   ;;  %vm3426_vm12 = vcmask 1041408   ;;  %s6897_s1 = inlined_call_operand.vmem [shape: bf16[128,128], index: 1, kind: input, shape index: {}]   ;;  %s6898_s0 = inlined_call_operand.vmem [shape: bf16[128,128], index: 0, kind: input, shape index: {}]   ;;  %s6899_s2 = inlined_call_operand.vmem [shape: f32[3,128], index: 2, kind: input, shape index: {}]   ;;  %s6900_s3 = inlined_call_operand.vmem [shape: bf16[288,128], index: 3, kind: input, shape index: {}]   ;;  %s6901_s4 = inlined_call_operand.vmem [shape: bf16[1152,128], index: 4, kind: input, shape index: {}]   ;;  %s6902_s5 = inlined_call_operand.vmem [shape: f32[3,128], index: 5, kind: input, shape index: {}]   ;;  %s6903_s6 = inlined_call_operand.vmem [shape: bf16[72,32], index: 6, kind: input, shape index: {}]   ;;  %s6904_s7 = inlined_call_operand.vmem [shape: bf16[1152,128], index: 7, kind: input, shape index: {}]   ;;  %s6905_s10 = inlined_call_operand.vmem [shape: bf16[1152,256], index: 10, kind: input, shape index: {}]   ;;  %s6906_s8 = inlined_call_operand.vmem [shape: f32[3,128], index: 8, kind: input, shape index: {}]   ;;  %s6907_s9 = inlined_call_operand.vmem [shape: bf16[18,8], index: 9, kind: input, shape index: {}]   ;;  %s6908_s11 = inlined_call_operand.vmem [shape: f32[3,256], index: 11, kind: input, shape index: {}]   ;;  %s6909_s12 = inlined_call_operand.vmem [shape: f32[2,256], index: 12, kind: output, shape index: {}]  }
   0x1   :  { %v4863_v0 = vld [vmem:[%s6897_s1 + $0x38] sm:$0xff]  ;;  %v4862_v1 = vld [vmem:[%s6897_s1 + $0x30] sm:$0xff]  ;;  %v4861_v2 = vld [vmem:[%s6897_s1 + $0x28] sm:$0xff] }
   0x2   :  { %172 = vmatpush.bf16.msra.mxu0 %v4863_v0  ;;  %v4860_v3 = vld [vmem:[%s6897_s1 + $0x20] sm:$0xff]  ;;  %v4859_v4 = vld [vmem:[%s6897_s1 + $0x18] sm:$0xff]  ;;  %v4858_v5 = vld [vmem:[%s6897_s1 + $0x10] sm:$0xff] }
   0x3   :  { %v4857_v6 = vld [vmem:[%s6897_s1 + $0x8] sm:$0xff]  ;;  %v4856_v7 = vld [vmem:[%s6897_s1] sm:$0xff]  ;;  %v4850_v10 = vld [vmem:[%s6898_s0 + $0x10] sm:$0xff] }
   0x4   :  { %v4848_v8 = vld [vmem:[%s6898_s0] sm:$0xff]  ;;  %v4849_v9 = vld [vmem:[%s6898_s0 + $0x8] sm:$0xff]  ;;  %v4851_v11 = vld [vmem:[%s6898_s0 + $0x18] sm:$0xff] }
   0x5   :  { %v4852_v12 = vld [vmem:[%s6898_s0 + $0x20] sm:$0xff]  ;;  %v4853_v13 = vld [vmem:[%s6898_s0 + $0x28] sm:$0xff]  ;;  %v4854_v14 = vld [vmem:[%s6898_s0 + $0x30] sm:$0xff] }
   0x6   :  { %173 = vmatpush.bf16.msra.mxu0 %v4862_v1  ;;  %v4855_v15 = vld [vmem:[%s6898_s0 + $0x38] sm:$0xff]  ;;  %v5301_v27 = vld [vmem:[%s6899_s2] sm:$0x7] }
   0x7   :  { %v5304_v28 = vperm.slane %v5301_v27, 0 }
   0xa   :  { %174 = vmatpush.bf16.msra.mxu0 %v4861_v2 }
   0xe   :  { %175 = vmatpush.bf16.msra.mxu0 %v4860_v3 }
  0x12   :  { %176 = vmatpush.bf16.msra.mxu0 %v4859_v4 }
  0x16   :  { %177 = vmatpush.bf16.msra.mxu0 %v4858_v5 }
  0x1a   :  { %178 = vmatpush.bf16.msra.mxu0 %v4857_v6 }
  0x1e   :  { %179 = vmatpush.bf16.msra.mxu0 %v4856_v7 }
  0x21   :  { %180 = vmatmul.bf16.vlgmr.msra.gmra.mxu0 %v4848_v8 }
  0x31   :  { %185 = vmatmul.bf16.gmra.mxu0 %v4849_v9 }
  0x41   :  { %190 = vmatmul.bf16.gmra.mxu0 %v4850_v10 }
  0x51   :  { %195 = vmatmul.bf16.gmra.mxu0 %v4851_v11 }
  0x61   :  { %200 = vmatmul.bf16.gmra.mxu0 %v4852_v12 }
  0x71   :  { %205 = vmatmul.bf16.gmra.mxu0 %v4853_v13 }
  0x81   :  { %210 = vmatmul.bf16.gmra.mxu0 %v4854_v14 }
  0x91   :  { %215 = vmatmul.bf16.gmra.mxu0 %v4855_v15 }
  0x9e   :  { %v181_v16 = vpop.f32.mrf.mxu0 }
  0x9f   :  { %v182_v30 = vadd.f32 %v181_v16, %v5304_v28 }
  0xa1   :  { %v5312_v35 = vmax.f32 %v182_v30, 0.0 }
  0xa3   :  { %v259_v41 = vmul.f32 %v5312_v35, %v5312_v35 }
  0xa6   :  { %v183_v17 = vpop.f32.mrf.mxu0 }
  0xa7   :  { %v184_v29 = vadd.f32 %v183_v17, %v5304_v28 }
  0xa9   :  { %v5309_v33 = vmax.f32 %v184_v29, 0.0 }
  0xab   :  { %v260_v38 = vmul.f32 %v5309_v33, %v5309_v33  ;;  %v237_v46 = vadd.f32 %v5309_v33, %v5312_v35 }
  0xad   :  { %v275_v47 = vadd.f32 %v260_v38, %v259_v41 }
  0xae   :  { %v186_v18 = vpop.f32.mrf.mxu0 }
  0xaf   :  { %v187_v31 = vadd.f32 %v186_v18, %v5304_v28 }
  0xb1   :  { %v5314_v36 = vmax.f32 %v187_v31, 0.0 }
  0xb3   :  { %v261_v42 = vmul.f32 %v5314_v36, %v5314_v36  ;;  %v238_v51 = vadd.f32 %v237_v46, %v5314_v36 }
  0xb5   :  { %v276_v52 = vadd.f32 %v275_v47, %v261_v42 }
  0xb6   :  { %v188_v19 = vpop.f32.mrf.mxu0 }
  0xb7   :  { %v189_v34 = vadd.f32 %v188_v19, %v5304_v28 }
  0xb9   :  { %v5319_v39 = vmax.f32 %v189_v34, 0.0 }
  0xbb   :  { %v262_v48 = vmul.f32 %v5319_v39, %v5319_v39  ;;  %v239_v56 = vadd.f32 %v238_v51, %v5319_v39 }
  0xbd   :  { %v277_v57 = vadd.f32 %v276_v52, %v262_v48 }
  0xbe   :  { %v191_v20 = vpop.f32.mrf.mxu0 }
  0xbf   :  { %v192_v37 = vadd.f32 %v191_v20, %v5304_v28 }
  0xc1   :  { %v5326_v43 = vmax.f32 %v192_v37, 0.0 }
  0xc3   :  { %v263_v53 = vmul.f32 %v5326_v43, %v5326_v43  ;;  %v240_v60 = vadd.f32 %v239_v56, %v5326_v43 }
  0xc5   :  { %v278_v62 = vadd.f32 %v277_v57, %v263_v53 }
  0xc6   :  { %v193_v21 = vpop.f32.mrf.mxu0 }
  0xc7   :  { %v194_v40 = vadd.f32 %v193_v21, %v5304_v28 }
  0xc9   :  { %v5333_v49 = vmax.f32 %v194_v40, 0.0 }
  0xcb   :  { %v264_v58 = vmul.f32 %v5333_v49, %v5333_v49  ;;  %v241_v2 = vadd.f32 %v240_v60, %v5333_v49 }
  0xcd   :  { %v279_v4 = vadd.f32 %v278_v62, %v264_v58 }
  0xce   :  { %v196_v22 = vpop.f32.mrf.mxu0 }
  0xcf   :  { %v197_v44 = vadd.f32 %v196_v22, %v5304_v28 }
  0xd1   :  { %v5339_v54 = vmax.f32 %v197_v44, 0.0 }
  0xd3   :  { %v265_v63 = vmul.f32 %v5339_v54, %v5339_v54  ;;  %v242_v6 = vadd.f32 %v241_v2, %v5339_v54 }
  0xd5   :  { %v280_v9 = vadd.f32 %v279_v4, %v265_v63 }
  0xd6   :  { %v198_v23 = vpop.f32.mrf.mxu0 }
  0xd7   :  { %v199_v50 = vadd.f32 %v198_v23, %v5304_v28 }
  0xd9   :  { %v5345_v59 = vmax.f32 %v199_v50, 0.0 }
  0xdb   :  { %v266_v5 = vmul.f32 %v5345_v59, %v5345_v59  ;;  %v243_v11 = vadd.f32 %v242_v6, %v5345_v59 }
  0xdd   :  { %v281_v14 = vadd.f32 %v280_v9, %v266_v5 }
  0xde   :  { %v201_v24 = vpop.f32.mrf.mxu0 }
  0xdf   :  { %v202_v55 = vadd.f32 %v201_v24, %v5304_v28 }
  0xe1   :  { %v5351_v0 = vmax.f32 %v202_v55, 0.0 }
  0xe3   :  { %v267_v10 = vmul.f32 %v5351_v0, %v5351_v0  ;;  %v244_v15 = vadd.f32 %v243_v11, %v5351_v0 }
  0xe5   :  { %v282_v19 = vadd.f32 %v281_v14, %v267_v10 }
  0xe6   :  { %v203_v25 = vpop.f32.mrf.mxu0 }
  0xe7   :  { %v204_v61 = vadd.f32 %v203_v25, %v5304_v28 }
  0xe9   :  { %v5358_v7 = vmax.f32 %v204_v61, 0.0 }
  0xeb   :  { %v268_v16 = vmul.f32 %v5358_v7, %v5358_v7  ;;  %v245_v21 = vadd.f32 %v244_v15, %v5358_v7 }
  0xed   :  { %v283_v25 = vadd.f32 %v282_v19, %v268_v16 }
  0xee   :  { %v206_v26 = vpop.f32.mrf.mxu0 }
  0xef   :  { %v207_v3 = vadd.f32 %v206_v26, %v5304_v28 }
  0xf1   :  { %v5364_v12 = vmax.f32 %v207_v3, 0.0 }
  0xf3   :  { %v269_v22 = vmul.f32 %v5364_v12, %v5364_v12  ;;  %v246_v26 = vadd.f32 %v245_v21, %v5364_v12 }
  0xf5   :  { %v284_v31 = vadd.f32 %v283_v25, %v269_v22 }
  0xf6   :  { %v208_v32 = vpop.f32.mrf.mxu0 }
  0xf7   :  { %v209_v8 = vadd.f32 %v208_v32, %v5304_v28 }
  0xf9   :  { %v5370_v17 = vmax.f32 %v209_v8, 0.0 }
  0xfb   :  { %v270_v29 = vmul.f32 %v5370_v17, %v5370_v17  ;;  %v247_v32 = vadd.f32 %v246_v26, %v5370_v17 }
  0xfd   :  { %v285_v38 = vadd.f32 %v284_v31, %v270_v29 }
  0xfe   :  { %v211_v45 = vpop.f32.mrf.mxu0 }
  0xff   :  { %v212_v13 = vadd.f32 %v211_v45, %v5304_v28 }
 0x101   :  { %v5376_v23 = vmax.f32 %v212_v13, 0.0 }
 0x103   :  { %v271_v34 = vmul.f32 %v5376_v23, %v5376_v23  ;;  %v248_v40 = vadd.f32 %v247_v32, %v5376_v23 }
 0x105   :  { %v286_v44 = vadd.f32 %v285_v38, %v271_v34 }
 0x106   :  { %v213_v1 = vpop.f32.mrf.mxu0 }
 0x107   :  { %v214_v18 = vadd.f32 %v213_v1, %v5304_v28 }
 0x109   :  { %v234_v30 = vmax.f32 %v214_v18, 0.0 }
 0x10b   :  { %v272_v41 = vmul.f32 %v234_v30, %v234_v30  ;;  %v249_v45 = vadd.f32 %v248_v40, %v234_v30 }
 0x10d   :  { %v287_v48 = vadd.f32 %v286_v44, %v272_v41 }
 0x10e   :  { %v216_v20 = vpop.f32.mrf.mxu0 }
 0x10f   :  { %v217_v24 = vadd.f32 %v216_v20, %v5304_v28 }
 0x111   :  { %v235_v37 = vmax.f32 %v217_v24, 0.0 }
 0x113   :  { %v273_v46 = vmul.f32 %v235_v37, %v235_v37  ;;  %v250_v50 = vadd.f32 %v249_v45, %v235_v37 }
 0x115   :  { %v288_v52 = vadd.f32 %v287_v48, %v273_v46 }
 0x116   :  { %v218_v42 = vpop.f32.mrf.mxu0 }
 0x117   :  { %v219_v47 = vadd.f32 %v218_v42, %v5304_v28 }
 0x119   :  { %v236_v51 = vmax.f32 %v219_v47, 0.0 }
 0x11b   :  { %v251_v53 = vadd.f32 %v250_v50, %v236_v51  ;;  %v274_v55 = vmul.f32 %v236_v51, %v236_v51 }
 0x11d   :  { %v252_v56 = vrot.slane %v251_v53, 4  ;;  %v289_v57 = vadd.f32 %v288_v52, %v274_v55 }
 0x11f   :  { %v253_v58 = vadd.f32 %v252_v56, %v251_v53  ;;  %v290_v60 = vrot.slane %v289_v57, 4 }
 0x121   :  { %v254_v61 = vrot.slane %v253_v58, 2  ;;  %v291_v62 = vadd.f32 %v290_v60, %v289_v57 }
 0x123   :  { %v255_v63 = vadd.f32 %v254_v61, %v253_v58  ;;  %v292_v1 = vrot.slane %v291_v62, 2 }
 0x125   :  { %v256_v2 = vrot.slane %v255_v63, 1  ;;  %v293_v3 = vadd.f32 %v292_v1, %v291_v62 }
 0x127   :  { %v257_v4 = vadd.f32 %v256_v2, %v255_v63  ;;  %v294_v5 = vrot.slane %v293_v3, 1 }
 0x129   :  { %v258_v6 = vmul.f32 0.0078125, %v257_v4  ;;  %v295_v28 = vadd.f32 %v294_v5, %v293_v3 }
 0x12b   :  { %v296_v8 = vmul.f32 0.0078125, %v295_v28  ;;  %v297_v9 = vmul.f32 %v258_v6, %v258_v6  ;;  %v4889_v28 = vld [vmem:[%s6901_s4 + $0x38] sm:$0xff] }
 0x12c   :  { %1198 = vmatpush.bf16.msra.mxu2 %v4889_v28  ;;  %v4878_v28 = vld [vmem:[%s6900_s3 + $0x70] sm:$0xff] }
 0x12d   :  { %v298_v10 = vsub.f32 %v296_v8, %v297_v9  ;;  %v4888_v8 = vld [vmem:[%s6901_s4 + $0x30] sm:$0xff]  ;;  %v4869_v9 = vld [vmem:[%s6900_s3 + $0x28] sm:$0xff] }
 0x12f   :  { %v299_v11 = vmax.f32 %v298_v10, 0.0  ;;  %v4887_v10 = vld [vmem:[%s6901_s4 + $0x28] sm:$0xff] }
 0x130   :  { %1199 = vmatpush.bf16.msra.mxu2 %v4888_v8 }
 0x131   :  { %v300_v13 = vadd.f32 1e-05, %v299_v11  ;;  %v4886_v11 = vld [vmem:[%s6901_s4 + $0x20] sm:$0xff] }
 0x133   :  { %5175 = vrsqrt.f32 %v300_v13  ;;  %vm307_vm1 = vweird.f32 %v300_v13 }
 0x134   :  { %1200 = vmatpush.bf16.msra.mxu2 %v4887_v10  ;;  %v4915_v10 = vld [vmem:[%s6901_s4 + $0x108] sm:$0xff] }
 0x138   :  { %1201 = vmatpush.bf16.msra.mxu2 %v4886_v11 }
 0x139   :  { %v5176_v14 = vpop.eup %5175 }
 0x13a   :  { %v302_v15 = vmul.f32 %v5176_v14, %v300_v13  ;;  %vm308_vm0 = vweird.f32 %v5176_v14  ;;  %v4885_v13 = vld [vmem:[%s6901_s4 + $0x18] sm:$0xff] }
 0x13b   :  { %vm309_vm2 = vmor %vm307_vm1, %vm308_vm0 }
 0x13c   :  { %v303_v16 = vmul.f32 %v5176_v14, %v302_v15  ;;  %1202 = vmatpush.bf16.msra.mxu2 %v4885_v13  ;;  %v4884_v15 = vld [vmem:[%s6901_s4 + $0x10] sm:$0xff] }
 0x13e   :  { %v304_v18 = vmul.f32 0.5, %v303_v16  ;;  %v4883_v16 = vld [vmem:[%s6901_s4 + $0x8] sm:$0xff] }
 0x140   :  { %v305_v19 = vsub.f32 1.5, %v304_v18  ;;  %1203 = vmatpush.bf16.msra.mxu2 %v4884_v15  ;;  %v4882_v18 = vld [vmem:[%s6901_s4] sm:$0xff]  ;;  %v4929_v15 = vld [vmem:[%s6901_s4 + $0x178] sm:$0xff] }
 0x142   :  { %v306_v20 = vmul.f32 %v5176_v14, %v305_v19  ;;  %v4897_v19 = vld [vmem:[%s6901_s4 + $0x78] sm:$0xff] }
 0x143   :  { %1217 = vmatpush.bf16.msra.mxu3 %v4897_v19  ;;  %v4928_v19 = vld [vmem:[%s6901_s4 + $0x170] sm:$0xff] }
 0x144   :  { %v310_v21 = vsel %vm309_vm2, %v5176_v14, %v306_v20  ;;  %v4870_v14 = vld [vmem:[%s6900_s3 + $0x30] sm:$0xff]  ;;  %1204 = vmatpush.bf16.msra.mxu2 %v4883_v16  ;;  %v4871_v20 = vld [vmem:[%s6900_s3 + $0x38] sm:$0xff] }
 0x145   :  { %v311_v22 = vmul.f32 %v310_v21, %v5301_v27  ;;  %v4896_v21 = vld [vmem:[%s6901_s4 + $0x70] sm:$0xff]  ;;  %v4879_v16 = vld [vmem:[%s6900_s3 + $0x78] sm:$0xff] }
 0x147   :  { %v329_v24 = vmul.f32 %v311_v22, %v258_v6  ;;  %v312_v25 = vperm.slane %v311_v22, 1  ;;  %v4864_v6 = vld [vmem:[%s6900_s3] sm:$0xff]  ;;  %1218 = vmatpush.bf16.msra.mxu3 %v4896_v21  ;;  %v4895_v22 = vld [vmem:[%s6901_s4 + $0x68] sm:$0xff] }
 0x148   :  { %1205 = vmatpush.bf16.msra.mxu2 %v4882_v18 }
 0x149   :  { %v331_v26 = vrot.slane %v329_v24, 7  ;;  %v327_v32 = vmul.f32 %v312_v25, %v235_v37  ;;  %v328_v34 = vmul.f32 %v312_v25, %v236_v51  ;;  %v325_v41 = vmul.f32 %v312_v25, %v5376_v23  ;;  %v4894_v24 = vld [vmem:[%s6901_s4 + $0x60] sm:$0xff] }
 0x14a   :  { %v326_v42 = vmul.f32 %v312_v25, %v234_v30  ;;  %v323_v47 = vmul.f32 %v312_v25, %v5364_v12  ;;  %v324_v48 = vmul.f32 %v312_v25, %v5370_v17  ;;  %v322_v37 = vmul.f32 %v312_v25, %v5358_v7 }
 0x14b   :  { %v333_v29 = vsub.f32 %v5301_v27, %v331_v26  ;;  %v321_v27 = vmul.f32 %v312_v25, %v5351_v0  ;;  %v319_v30 = vmul.f32 %v312_v25, %v5339_v54  ;;  %v320_v56 = vmul.f32 %v312_v25, %v5345_v59  ;;  %1219 = vmatpush.bf16.msra.mxu3 %v4895_v22  ;;  %v4872_v26 = vld [vmem:[%s6900_s3 + $0x40] sm:$0xff] }
 0x14c   :  { %v317_v17 = vmul.f32 %v312_v25, %v5326_v43  ;;  %v318_v60 = vmul.f32 %v312_v25, %v5333_v49  ;;  %v315_v7 = vmul.f32 %v312_v25, %v5314_v36  ;;  %v316_v63 = vmul.f32 %v312_v25, %v5319_v39  ;;  %v4865_v36 = vld [vmem:[%s6900_s3 + $0x8] sm:$0xff]  ;;  %v4868_v39 = vld [vmem:[%s6900_s3 + $0x20] sm:$0xff] }
 0x14d   :  { %v334_v31 = vperm.slane %v333_v29, 2  ;;  %v313_v59 = vmul.f32 %v312_v25, %v5312_v35  ;;  %v314_v3 = vmul.f32 %v312_v25, %v5309_v33  ;;  %v4866_v33 = vld [vmem:[%s6900_s3 + $0x10] sm:$0xff]  ;;  %v4867_v35 = vld [vmem:[%s6900_s3 + $0x18] sm:$0xff]  ;;  %v4926_v22 = vld [vmem:[%s6901_s4 + $0x160] sm:$0xff] }
 0x14e   :  { %v4893_v25 = vld [vmem:[%s6901_s4 + $0x58] sm:$0xff] }
 0x14f   :  { %v349_v38 = vadd.f32 %v334_v31, %v327_v32  ;;  %v350_v40 = vadd.f32 %v334_v31, %v328_v34  ;;  %v347_v45 = vadd.f32 %v334_v31, %v325_v41  ;;  %v348_v46 = vadd.f32 %v334_v31, %v326_v42  ;;  %1220 = vmatpush.bf16.msra.mxu3 %v4894_v24  ;;  %v4891_v32 = vld [vmem:[%s6901_s4 + $0x48] sm:$0xff]  ;;  %v4905_v41 = vld [vmem:[%s6901_s4 + $0xb8] sm:$0xff] }
 0x150   :  { %v345_v52 = vadd.f32 %v334_v31, %v323_v47  ;;  %v346_v53 = vadd.f32 %v334_v31, %v324_v48  ;;  %v343_v55 = vadd.f32 %v334_v31, %v321_v27  ;;  %v344_v23 = vadd.f32 %v334_v31, %v322_v37  ;;  %1236 = vmatpush.bf16.msrb.mxu2 %v4905_v41  ;;  %v4873_v42 = vld [vmem:[%s6900_s3 + $0x48] sm:$0xff]  ;;  %v4902_v48 = vld [vmem:[%s6901_s4 + $0xa0] sm:$0xff]  ;;  %v4900_v37 = vld [vmem:[%s6901_s4 + $0x90] sm:$0xff] }
 0x151   :  { %v394_v44 = vpack.c.bf16 %v350_v40, %v349_v38  ;;  %v393_v50 = vpack.c.bf16 %v348_v46, %v347_v45  ;;  %v341_v12 = vadd.f32 %v334_v31, %v319_v30  ;;  %v342_v58 = vadd.f32 %v334_v31, %v320_v56  ;;  %v4890_v38 = vld [vmem:[%s6901_s4 + $0x40] sm:$0xff]  ;;  %v4904_v45 = vld [vmem:[%s6901_s4 + $0xb0] sm:$0xff]  ;;  %v4903_v46 = vld [vmem:[%s6901_s4 + $0xa8] sm:$0xff] }
 0x152   :  { %v392_v51 = vpack.c.bf16 %v346_v53, %v345_v52  ;;  %v391_v57 = vpack.c.bf16 %v344_v23, %v343_v55  ;;  %v339_v0 = vadd.f32 %v334_v31, %v317_v17  ;;  %v340_v62 = vadd.f32 %v334_v31, %v318_v60  ;;  %v4901_v52 = vld [vmem:[%s6901_s4 + $0x98] sm:$0xff]  ;;  %v4874_v53 = vld [vmem:[%s6900_s3 + $0x50] sm:$0xff]  ;;  %v4898_v30 = vld [vmem:[%s6901_s4 + $0x80] sm:$0xff] }
 0x153   :  { %503 = vmatpush.bf16.msra.mxu1 %v394_v44  ;;  %v390_v61 = vpack.c.bf16 %v342_v58, %v341_v12  ;;  %v337_v54 = vadd.f32 %v334_v31, %v315_v7  ;;  %v338_v2 = vadd.f32 %v334_v31, %v316_v63  ;;  %v335_v43 = vadd.f32 %v334_v31, %v313_v59  ;;  %v4913_v56 = vld [vmem:[%s6901_s4 + $0xf8] sm:$0xff]  ;;  %v4912_v58 = vld [vmem:[%s6901_s4 + $0xf0] sm:$0xff]  ;;  %v4911_v17 = vld [vmem:[%s6901_s4 + $0xe8] sm:$0xff] }
 0x154   :  { %v389_v1 = vpack.c.bf16 %v340_v62, %v339_v0  ;;  %v336_v5 = vadd.f32 %v334_v31, %v314_v3  ;;  %1221 = vmatpush.bf16.msra.mxu3 %v4893_v25  ;;  %v4892_v31 = vld [vmem:[%s6901_s4 + $0x50] sm:$0xff]  ;;  %1237 = vmatpush.bf16.msrb.mxu2 %v4904_v45  ;;  %v4909_v62 = vld [vmem:[%s6901_s4 + $0xd8] sm:$0xff]  ;;  %v4876_v7 = vld [vmem:[%s6900_s3 + $0x60] sm:$0xff] }
 0x155   :  { %v388_v4 = vpack.c.bf16 %v338_v2, %v337_v54  ;;  %v4907_v54 = vld [vmem:[%s6901_s4 + $0xc8] sm:$0xff]  ;;  %v4906_v3 = vld [vmem:[%s6901_s4 + $0xc0] sm:$0xff]  ;;  %v4925_v25 = vld [vmem:[%s6901_s4 + $0x158] sm:$0xff] }
 0x156   :  { %v387_v49 = vpack.c.bf16 %v336_v5, %v335_v43  ;;  %v4877_v43 = vld [vmem:[%s6900_s3 + $0x68] sm:$0xff]  ;;  %v4922_v41 = vld [vmem:[%s6901_s4 + $0x140] sm:$0xff] }
 0x157   :  { %504 = vmatpush.bf16.msra.mxu1 %v393_v50 }
 0x158   :  { %1222 = vmatpush.bf16.msra.mxu3 %v4892_v31  ;;  %1238 = vmatpush.bf16.msrb.mxu2 %v4903_v46  ;;  %v4924_v31 = vld [vmem:[%s6901_s4 + $0x150] sm:$0xff] }
 0x159   :  { %v4936_v46 = vld [vmem:[%s6901_s4 + $0x1b0] sm:$0xff] }
 0x15b   :  { %505 = vmatpush.bf16.msra.mxu1 %v392_v51  ;;  %v4899_v51 = vld [vmem:[%s6901_s4 + $0x88] sm:$0xff] }
 0x15c   :  { %1223 = vmatpush.bf16.msra.mxu3 %v4891_v32  ;;  %1239 = vmatpush.bf16.msrb.mxu2 %v4902_v48  ;;  %v4953_v32 = vld [vmem:[%s6901_s4 + $0x238] sm:$0xff]  ;;  %v4935_v48 = vld [vmem:[%s6901_s4 + $0x1a8] sm:$0xff] }
 0x15d   :  { %1350 = vmatpush.bf16.msrb.mxu0 %v4953_v32 }
 0x15f   :  { %506 = vmatpush.bf16.msra.mxu1 %v391_v57  ;;  %v4875_v57 = vld [vmem:[%s6900_s3 + $0x58] sm:$0xff] }
 0x160   :  { %1224 = vmatpush.bf16.msra.mxu3 %v4890_v38  ;;  %1240 = vmatpush.bf16.msrb.mxu2 %v4901_v52 }
 0x163   :  { %507 = vmatpush.bf16.msra.mxu1 %v390_v61  ;;  %v4910_v61 = vld [vmem:[%s6901_s4 + $0xe0] sm:$0xff] }
 0x164   :  { %1241 = vmatpush.bf16.msrb.mxu2 %v4900_v37  ;;  %1255 = vmatpush.bf16.msrb.mxu3 %v4913_v56 }
 0x167   :  { %508 = vmatpush.bf16.msra.mxu1 %v389_v1  ;;  %v4908_v1 = vld [vmem:[%s6901_s4 + $0xd0] sm:$0xff] }
 0x168   :  { %1242 = vmatpush.bf16.msrb.mxu2 %v4899_v51  ;;  %1256 = vmatpush.bf16.msrb.mxu3 %v4912_v58  ;;  %v4932_v51 = vld [vmem:[%s6901_s4 + $0x190] sm:$0xff] }
 0x16b   :  { %509 = vmatpush.bf16.msra.mxu1 %v388_v4  ;;  %v4921_v4 = vld [vmem:[%s6901_s4 + $0x138] sm:$0xff] }
 0x16c   :  { %1243 = vmatpush.bf16.msrb.mxu2 %v4898_v30  ;;  %1257 = vmatpush.bf16.msrb.mxu3 %v4911_v17  ;;  %v5633_v30 = vld [vmem:[%s6902_s5] sm:$0x7] }
 0x16d   :  { %v4930_v17 = vld [vmem:[%s6901_s4 + $0x180] sm:$0xff] }
 0x16f   :  { %510 = vmatpush.bf16.msra.mxu1 %v387_v49  ;;  %v4920_v49 = vld [vmem:[%s6901_s4 + $0x130] sm:$0xff] }
 0x170   :  { %1258 = vmatpush.bf16.msrb.mxu3 %v4910_v61 }
 0x172   :  { %511 = vmatmul.bf16.vlgmr.msra.gmra.mxu1 %v4864_v6  ;;  %v4919_v6 = vld [vmem:[%s6901_s4 + $0x128] sm:$0xff] }
 0x174   :  { %1259 = vmatpush.bf16.msrb.mxu3 %v4909_v62 }
 0x178   :  { %1260 = vmatpush.bf16.msrb.mxu3 %v4908_v1  ;;  %v4944_v1 = vld [vmem:[%s6901_s4 + $0x1f0] sm:$0xff] }
 0x17c   :  { %1261 = vmatpush.bf16.msrb.mxu3 %v4907_v54  ;;  %v4950_v54 = vld [vmem:[%s6901_s4 + $0x220] sm:$0xff] }
 0x180   :  { %1262 = vmatpush.bf16.msrb.mxu3 %v4906_v3 }
 0x182   :  { %516 = vmatmul.bf16.gmra.mxu1 %v4865_v36 }
 0x192   :  { %521 = vmatmul.bf16.gmra.mxu1 %v4866_v33  ;;  %v4918_v33 = vld [vmem:[%s6901_s4 + $0x120] sm:$0xff] }
 0x1a2   :  { %526 = vmatmul.bf16.gmra.mxu1 %v4867_v35 }
 0x1b2   :  { %531 = vmatmul.bf16.gmra.mxu1 %v4868_v39  ;;  %v4917_v39 = vld [vmem:[%s6901_s4 + $0x118] sm:$0xff] }
 0x1c2   :  { %536 = vmatmul.bf16.gmra.mxu1 %v4869_v9  ;;  %v4916_v9 = vld [vmem:[%s6901_s4 + $0x110] sm:$0xff] }
 0x1d2   :  { %541 = vmatmul.bf16.gmra.mxu1 %v4870_v14  ;;  %v4914_v14 = vld [vmem:[%s6901_s4 + $0x100] sm:$0xff] }
 0x1e2   :  { %546 = vmatmul.bf16.gmra.mxu1 %v4871_v20  ;;  %v4927_v20 = vld [vmem:[%s6901_s4 + $0x168] sm:$0xff] }
 0x1ef   :  { %v512_v29 = vpop.f32.mrf.mxu1 }
 0x1f2   :  { %551 = vmatmul.bf16.gmra.mxu1 %v4872_v26  ;;  %v4880_v26 = vld [vmem:[%s6900_s3 + $0x80] sm:$0xff] }
 0x1f7   :  { %v514_v34 = vpop.f32.mrf.mxu1 }
 0x1f8   :  { %v602_v40 = vpack.c.bf16 %v514_v34, %v512_v29  ;;  %v4923_v34 = vld [vmem:[%s6901_s4 + $0x148] sm:$0xff] }
 0x1fa   :  { %1206 = vmatmul.bf16.vlgmr.msra.gmra.mxu2 %v602_v40 }
 0x1fb   :  { %1274 = vmatpush.bf16.msra.mxu2 %v4921_v4 }
 0x1ff   :  { %v517_v44 = vpop.f32.mrf.mxu1  ;;  %1275 = vmatpush.bf16.msra.mxu2 %v4920_v49  ;;  %v4941_v49 = vld [vmem:[%s6901_s4 + $0x1d8] sm:$0xff] }
 0x202   :  { %556 = vmatmul.bf16.gmra.mxu1 %v4873_v42  ;;  %v4937_v42 = vld [vmem:[%s6901_s4 + $0x1b8] sm:$0xff] }
 0x203   :  { %1276 = vmatpush.bf16.msra.mxu2 %v4919_v6 }
 0x207   :  { %v519_v47 = vpop.f32.mrf.mxu1  ;;  %1277 = vmatpush.bf16.msra.mxu2 %v4918_v33 }
 0x208   :  { %v611_v50 = vpack.c.bf16 %v519_v47, %v517_v44  ;;  %v4881_v44 = vld [vmem:[%s6900_s3 + $0x88] sm:$0xff]  ;;  %v4952_v47 = vld [vmem:[%s6901_s4 + $0x230] sm:$0xff] }
 0x209   :  { %1351 = vmatpush.bf16.msrb.mxu0 %v4952_v47 }
 0x20a   :  { %1211 = vmatmul.bf16.gmra.mxu2 %v611_v50 }
 0x20b   :  { %1278 = vmatpush.bf16.msra.mxu2 %v4917_v39  ;;  %v4940_v39 = vld [vmem:[%s6901_s4 + $0x1d0] sm:$0xff] }
 0x20f   :  { %v522_v27 = vpop.f32.mrf.mxu1  ;;  %1279 = vmatpush.bf16.msra.mxu2 %v4916_v9 }
 0x212   :  { %561 = vmatmul.bf16.gmra.mxu1 %v4874_v53  ;;  %v4934_v53 = vld [vmem:[%s6901_s4 + $0x1a0] sm:$0xff] }
 0x213   :  { %1280 = vmatpush.bf16.msra.mxu2 %v4915_v10 }
 0x217   :  { %v524_v55 = vpop.f32.mrf.mxu1  ;;  %1281 = vmatpush.bf16.msra.mxu2 %v4914_v14 }
 0x218   :  { %v603_v23 = vpack.c.bf16 %v524_v55, %v522_v27  ;;  %v4933_v27 = vld [vmem:[%s6901_s4 + $0x198] sm:$0xff]  ;;  %v4951_v55 = vld [vmem:[%s6901_s4 + $0x228] sm:$0xff] }
 0x219   :  { %1352 = vmatpush.bf16.msrb.mxu0 %v4951_v55 }
 0x21a   :  { %1225 = vmatmul.bf16.vlgmr.msra.gmra.mxu3 %v603_v23  ;;  %v4931_v23 = vld [vmem:[%s6901_s4 + $0x188] sm:$0xff] }
 0x21b   :  { %1293 = vmatpush.bf16.msra.mxu3 %v4929_v15 }
 0x21d   :  { %1353 = vmatpush.bf16.msrb.mxu0 %v4950_v54 }
 0x21f   :  { %v527_v12 = vpop.f32.mrf.mxu1  ;;  %1294 = vmatpush.bf16.msra.mxu3 %v4928_v19 }
 0x222   :  { %566 = vmatmul.bf16.gmra.mxu1 %v4875_v57 }
 0x223   :  { %1295 = vmatpush.bf16.msra.mxu3 %v4927_v20 }
 0x227   :  { %v529_v60 = vpop.f32.mrf.mxu1  ;;  %1296 = vmatpush.bf16.msra.mxu3 %v4926_v22  ;;  %v4947_v22 = vld [vmem:[%s6901_s4 + $0x208] sm:$0xff] }
 0x228   :  { %v612_v0 = vpack.c.bf16 %v529_v60, %v527_v12  ;;  %v5636_v12 = vperm.slane %v5633_v30, 0  ;;  %v4945_v60 = vld [vmem:[%s6901_s4 + $0x1f8] sm:$0xff] }
 0x22a   :  { %1230 = vmatmul.bf16.gmra.mxu3 %v612_v0 }
 0x22b   :  { %1297 = vmatpush.bf16.msra.mxu3 %v4925_v25 }
 0x22f   :  { %v532_v63 = vpop.f32.mrf.mxu1  ;;  %1298 = vmatpush.bf16.msra.mxu3 %v4924_v31 }
 0x232   :  { %571 = vmatmul.bf16.gmra.mxu1 %v4876_v7 }
 0x233   :  { %1299 = vmatpush.bf16.msra.mxu3 %v4923_v34 }
 0x237   :  { %v534_v2 = vpop.f32.mrf.mxu1  ;;  %1300 = vmatpush.bf16.msra.mxu3 %v4922_v41 }
 0x238   :  { %v604_v59 = vpack.c.bf16 %v534_v2, %v532_v63  ;;  %v4943_v2 = vld [vmem:[%s6901_s4 + $0x1e8] sm:$0xff] }
 0x23a   :  { %1244 = vmatmul.bf16.vlgmr.msrb.gmra.mxu2 %v604_v59 }
 0x23b   :  { %1312 = vmatpush.bf16.msrb.mxu2 %v4937_v42 }
 0x23f   :  { %v537_v5 = vpop.f32.mrf.mxu1  ;;  %1313 = vmatpush.bf16.msrb.mxu2 %v4936_v46 }
 0x242   :  { %576 = vmatmul.bf16.gmra.mxu1 %v4877_v43  ;;  %v4942_v43 = vld [vmem:[%s6901_s4 + $0x1e0] sm:$0xff] }
 0x243   :  { %1314 = vmatpush.bf16.msrb.mxu2 %v4935_v48 }
 0x247   :  { %v539_v36 = vpop.f32.mrf.mxu1  ;;  %1315 = vmatpush.bf16.msrb.mxu2 %v4934_v53 }
 0x248   :  { %v613_v35 = vpack.c.bf16 %v539_v36, %v537_v5 }
 0x24a   :  { %1249 = vmatmul.bf16.gmra.mxu2 %v613_v35 }
 0x24b   :  { %1316 = vmatpush.bf16.msrb.mxu2 %v4933_v27 }
 0x24f   :  { %v542_v8 = vpop.f32.mrf.mxu1  ;;  %1317 = vmatpush.bf16.msrb.mxu2 %v4932_v51 }
 0x252   :  { %581 = vmatmul.bf16.gmra.mxu1 %v4878_v28  ;;  %v4949_v28 = vld [vmem:[%s6901_s4 + $0x218] sm:$0xff] }
 0x253   :  { %1318 = vmatpush.bf16.msrb.mxu2 %v4931_v23  ;;  %1354 = vmatpush.bf16.msrb.mxu0 %v4949_v28 }
 0x257   :  { %v544_v11 = vpop.f32.mrf.mxu1  ;;  %1319 = vmatpush.bf16.msrb.mxu2 %v4930_v17 }
 0x258   :  { %v605_v13 = vpack.c.bf16 %v544_v11, %v542_v8  ;;  %v4939_v8 = vld [vmem:[%s6901_s4 + $0x1c8] sm:$0xff] }
 0x25a   :  { %1263 = vmatmul.bf16.vlgmr.msrb.gmra.mxu3 %v605_v13  ;;  %v4938_v13 = vld [vmem:[%s6901_s4 + $0x1c0] sm:$0xff] }
 0x25b   :  { %1331 = vmatpush.bf16.msrb.mxu3 %v4945_v60 }
 0x25f   :  { %v547_v18 = vpop.f32.mrf.mxu1  ;;  %1332 = vmatpush.bf16.msrb.mxu3 %v4944_v1 }
 0x262   :  { %586 = vmatmul.bf16.gmra.mxu1 %v4879_v16 }
 0x263   :  { %1333 = vmatpush.bf16.msrb.mxu3 %v4943_v2 }
 0x267   :  { %v549_v21 = vpop.f32.mrf.mxu1  ;;  %1334 = vmatpush.bf16.msrb.mxu3 %v4942_v43 }
 0x268   :  { %v614_v24 = vpack.c.bf16 %v549_v21, %v547_v18  ;;  %v4948_v18 = vld [vmem:[%s6901_s4 + $0x210] sm:$0xff] }
 0x269   :  { %1355 = vmatpush.bf16.msrb.mxu0 %v4948_v18 }
 0x26a   :  { %1268 = vmatmul.bf16.gmra.mxu3 %v614_v24 }
 0x26b   :  { %1335 = vmatpush.bf16.msrb.mxu3 %v4941_v49 }
 0x26d   :  { %1356 = vmatpush.bf16.msrb.mxu0 %v4947_v22 }
 0x26f   :  { %v552_v29 = vpop.f32.mrf.mxu1  ;;  %1336 = vmatpush.bf16.msrb.mxu3 %v4940_v39 }
 0x272   :  { %591 = vmatmul.bf16.gmra.mxu1 %v4880_v26 }
 0x273   :  { %1337 = vmatpush.bf16.msrb.mxu3 %v4939_v8 }
 0x277   :  { %v554_v38 = vpop.f32.mrf.mxu1  ;;  %1338 = vmatpush.bf16.msrb.mxu3 %v4938_v13 }
 0x278   :  { %v606_v40 = vpack.c.bf16 %v554_v38, %v552_v29  ;;  %v4946_v29 = vld [vmem:[%s6901_s4 + $0x200] sm:$0xff] }
 0x279   :  { %1357 = vmatpush.bf16.msrb.mxu0 %v4946_v29 }
 0x27a   :  { %1282 = vmatmul.bf16.vlgmr.msra.gmra.mxu2 %v606_v40 }
 0x27d   :  { %v1207_v56 = vpop.f32.mrf.mxu2 }
 0x27e   :  { %v1208_v61 = vadd.f32 %v1207_v56, %v5636_v12 }
 0x27f   :  { %v557_v45 = vpop.f32.mrf.mxu1 }
 0x282   :  { %596 = vmatmul.bf16.gmra.mxu1 %v4881_v44 }
 0x285   :  { %v5645_v7 = vpop.f32.mrf.mxu2 }
 0x287   :  { %v559_v50 = vpop.f32.mrf.mxu1 }
 0x288   :  { %v615_v52 = vpack.c.bf16 %v559_v50, %v557_v45 }
 0x28a   :  { %1287 = vmatmul.bf16.gmra.mxu2 %v615_v52 }
 0x28d   :  { %v1212_v5 = vpop.f32.mrf.mxu2 }
 0x28e   :  { %v1213_v6 = vadd.f32 %v1212_v5, %v5636_v12 }
 0x28f   :  { %v562_v37 = vpop.f32.mrf.mxu1 }
 0x295   :  { %v5676_v9 = vpop.f32.mrf.mxu2 }
 0x297   :  { %v564_v57 = vpop.f32.mrf.mxu1 }
 0x298   :  { %v607_v58 = vpack.c.bf16 %v564_v57, %v562_v37 }
 0x29a   :  { %1301 = vmatmul.bf16.vlgmr.msra.gmra.mxu3 %v607_v58 }
 0x29d   :  { %v1226_v0 = vpop.f32.mrf.mxu3 }
 0x29e   :  { %v1227_v62 = vadd.f32 %v1226_v0, %v1208_v61 }
 0x29f   :  { %v567_v63 = vpop.f32.mrf.mxu1 }
 0x2a5   :  { %v5656_v59 = vpop.f32.mrf.mxu3 }
 0x2a7   :  { %v569_v3 = vpop.f32.mrf.mxu1 }
 0x2a8   :  { %v616_v4 = vpack.c.bf16 %v569_v3, %v567_v63 }
 0x2aa   :  { %1306 = vmatmul.bf16.gmra.mxu3 %v616_v4 }
 0x2ad   :  { %v1231_v36 = vpop.f32.mrf.mxu3 }
 0x2ae   :  { %v5665_v33 = vadd.f32 %v1231_v36, %v1213_v6 }
 0x2af   :  { %v572_v35 = vpop.f32.mrf.mxu1 }
 0x2b5   :  { %v1233_v24 = vpop.f32.mrf.mxu3 }
 0x2b7   :  { %v574_v10 = vpop.f32.mrf.mxu1 }
 0x2b8   :  { %v608_v11 = vpack.c.bf16 %v574_v10, %v572_v35 }
 0x2ba   :  { %1320 = vmatmul.bf16.vlgmr.msrb.gmra.mxu2 %v608_v11 }
 0x2bd   :  { %v1245_v14 = vpop.f32.mrf.mxu2 }
 0x2be   :  { %v1246_v15 = vadd.f32 %v1245_v14, %v1227_v62  ;;  %v1210_v62 = vadd.f32 %v5645_v7, %v5636_v12  ;;  %v1215_v7 = vadd.f32 %v5676_v9, %v5636_v12 }
 0x2bf   :  { %v577_v16 = vpop.f32.mrf.mxu1 }
 0x2c0   :  { %v1229_v63 = vadd.f32 %v5656_v59, %v1210_v62 }
 0x2c5   :  { %v1247_v48 = vpop.f32.mrf.mxu2 }
 0x2c6   :  { %v1248_v1 = vadd.f32 %v1247_v48, %v1229_v63 }
 0x2c7   :  { %v579_v19 = vpop.f32.mrf.mxu1 }
 0x2c8   :  { %v617_v20 = vpack.c.bf16 %v579_v19, %v577_v16  ;;  %v1234_v16 = vadd.f32 %v1233_v24, %v1215_v7 }
 0x2ca   :  { %1325 = vmatmul.bf16.gmra.mxu2 %v617_v20 }
 0x2cd   :  { %v1250_v52 = vpop.f32.mrf.mxu2 }
 0x2ce   :  { %v1251_v6 = vadd.f32 %v1250_v52, %v5665_v33 }
 0x2cf   :  { %v582_v21 = vpop.f32.mrf.mxu1 }
 0x2d5   :  { %v1252_v27 = vpop.f32.mrf.mxu2 }
 0x2d6   :  { %v1253_v20 = vadd.f32 %v1252_v27, %v1234_v16 }
 0x2d7   :  { %v584_v25 = vpop.f32.mrf.mxu1 }
 0x2d8   :  { %v609_v26 = vpack.c.bf16 %v584_v25, %v582_v21 }
 0x2da   :  { %1339 = vmatmul.bf16.vlgmr.msrb.gmra.mxu3 %v609_v26 }
 0x2dd   :  { %v1264_v31 = vpop.f32.mrf.mxu3 }
 0x2de   :  { %v1265_v32 = vadd.f32 %v1264_v31, %v1246_v15 }
 0x2df   :  { %v587_v34 = vpop.f32.mrf.mxu1 }
 0x2e5   :  { %v1266_v50 = vpop.f32.mrf.mxu3 }
 0x2e6   :  { %v1267_v2 = vadd.f32 %v1266_v50, %v1248_v1 }
 0x2e7   :  { %v589_v38 = vpop.f32.mrf.mxu1 }
 0x2e8   :  { %v618_v40 = vpack.c.bf16 %v589_v38, %v587_v34 }
 0x2ea   :  { %1344 = vmatmul.bf16.gmra.mxu3 %v618_v40 }
 0x2ed   :  { %v1269_v53 = vpop.f32.mrf.mxu3 }
 0x2ee   :  { %v1270_v39 = vadd.f32 %v1269_v53, %v1251_v6 }
 0x2ef   :  { %v592_v41 = vpop.f32.mrf.mxu1 }
 0x2f5   :  { %v1271_v37 = vpop.f32.mrf.mxu3 }
 0x2f6   :  { %v1272_v22 = vadd.f32 %v1271_v37, %v1253_v20 }
 0x2f7   :  { %v594_v42 = vpop.f32.mrf.mxu1 }
 0x2f8   :  { %v610_v44 = vpack.c.bf16 %v594_v42, %v592_v41 }
 0x2fa   :  { %1358 = vmatmul.bf16.vlgmr.msrb.gmra.mxu0 %v610_v44 }
 0x2fd   :  { %v1283_v51 = vpop.f32.mrf.mxu2 }
 0x2fe   :  { %v1284_v5 = vadd.f32 %v1283_v51, %v1265_v32 }
 0x2ff   :  { %v597_v45 = vpop.f32.mrf.mxu1 }
 0x305   :  { %v1285_v23 = vpop.f32.mrf.mxu2 }
 0x306   :  { %v1286_v43 = vadd.f32 %v1285_v23, %v1267_v2 }
 0x307   :  { %v599_v46 = vpop.f32.mrf.mxu1 }
 0x308   :  { %v619_v47 = vpack.c.bf16 %v599_v46, %v597_v45 }
 0x30a   :  { %1363 = vmatmul.bf16.gmra.mxu0 %v619_v47 }
 0x30d   :  { %v1288_v57 = vpop.f32.mrf.mxu2 }
 0x30e   :  { %v1289_v59 = vadd.f32 %v1288_v57, %v1270_v39 }
 0x315   :  { %v1290_v17 = vpop.f32.mrf.mxu2 }
 0x316   :  { %v1291_v31 = vadd.f32 %v1290_v17, %v1272_v22 }
 0x31d   :  { %v1302_v55 = vpop.f32.mrf.mxu3 }
 0x31e   :  { %v1303_v36 = vadd.f32 %v1302_v55, %v1284_v5 }
 0x325   :  { %v1304_v56 = vpop.f32.mrf.mxu3 }
 0x326   :  { %v1305_v49 = vadd.f32 %v1304_v56, %v1286_v43 }
 0x32d   :  { %v1307_v58 = vpop.f32.mrf.mxu3 }
 0x32e   :  { %v1308_v18 = vadd.f32 %v1307_v58, %v1289_v59 }
 0x335   :  { %v1309_v60 = vpop.f32.mrf.mxu3 }
 0x336   :  { %v1310_v34 = vadd.f32 %v1309_v60, %v1291_v31 }
 0x33d   :  { %v1321_v61 = vpop.f32.mrf.mxu2 }
 0x33e   :  { %v1322_v28 = vadd.f32 %v1321_v61, %v1303_v36 }
 0x345   :  { %v1323_v54 = vpop.f32.mrf.mxu2 }
 0x346   :  { %v1324_v35 = vadd.f32 %v1323_v54, %v1305_v49 }
 0x34d   :  { %v1326_v10 = vpop.f32.mrf.mxu2 }
 0x34e   :  { %v1327_v21 = vadd.f32 %v1326_v10, %v1308_v18 }
 0x355   :  { %v1328_v9 = vpop.f32.mrf.mxu2 }
 0x356   :  { %v1329_v42 = vadd.f32 %v1328_v9, %v1310_v34  ;;  %v4964_v9 = vld [vmem:[%s6904_s7 + $0x30] sm:$0xff] }
 0x357   :  { %v4972_v34 = vld [vmem:[%s6904_s7 + $0x70] sm:$0xff] }
 0x35d   :  { %v1340_v0 = vpop.f32.mrf.mxu3 }
 0x35e   :  { %v1341_v13 = vadd.f32 %v1340_v0, %v1322_v28 }
 0x365   :  { %v1342_v3 = vpop.f32.mrf.mxu3 }
 0x366   :  { %v1343_v8 = vadd.f32 %v1342_v3, %v1324_v35 }
 0x36d   :  { %v1345_v15 = vpop.f32.mrf.mxu3 }
 0x36e   :  { %v1346_v25 = vadd.f32 %v1345_v15, %v1327_v21 }
 0x375   :  { %v1347_v41 = vpop.f32.mrf.mxu3 }
 0x376   :  { %v1348_v47 = vadd.f32 %v1347_v41, %v1329_v42  ;;  %v4970_v41 = vld [vmem:[%s6904_s7 + $0x60] sm:$0xff]  ;;  %v4957_v42 = vld [vmem:[%s6903_s6 + $0x18] sm:$0xff] }
 0x377   :  { %v1359_v4 = vpop.f32.mrf.mxu0 }
 0x378   :  { %v1360_v19 = vadd.f32 %v1359_v4, %v1341_v13 }
 0x37a   :  { %v1369_v26 = vmax.f32 %v1360_v19, 0.0 }
 0x37c   :  { %v1383_v38 = vmul.f32 %v1369_v26, %v1369_v26 }
 0x37f   :  { %v1361_v11 = vpop.f32.mrf.mxu0 }
 0x380   :  { %v1362_v14 = vadd.f32 %v1361_v11, %v1343_v8 }
 0x382   :  { %v5696_v33 = vmax.f32 %v1362_v14, 0.0 }
 0x384   :  { %v1384_v32 = vmul.f32 %v5696_v33, %v5696_v33  ;;  %v1373_v24 = vadd.f32 %v5696_v33, %v1369_v26 }
 0x386   :  { %v1387_v44 = vadd.f32 %v1384_v32, %v1383_v38  ;;  %v4954_v32 = vld [vmem:[%s6903_s6] sm:$0xff]  ;;  %v4963_v38 = vld [vmem:[%s6904_s7 + $0x28] sm:$0xff] }
 0x387   :  { %v1364_v29 = vpop.f32.mrf.mxu0 }
 0x388   :  { %v1365_v12 = vadd.f32 %v1364_v29, %v1346_v25 }
 0x38a   :  { %v1371_v40 = vmax.f32 %v1365_v12, 0.0  ;;  %v4973_v12 = vld [vmem:[%s6904_s7 + $0x78] sm:$0xff] }
 0x38b   :  { %2110 = vmatpush.bf16.msra.mxu0 %v4973_v12 }
 0x38c   :  { %v1374_v45 = vadd.f32 %v1373_v24, %v1371_v40  ;;  %v1385_v46 = vmul.f32 %v1371_v40, %v1371_v40  ;;  %v4971_v24 = vld [vmem:[%s6904_s7 + $0x68] sm:$0xff] }
 0x38e   :  { %v1388_v48 = vadd.f32 %v1387_v44, %v1385_v46  ;;  %v4961_v44 = vld [vmem:[%s6904_s7 + $0x18] sm:$0xff]  ;;  %v4960_v46 = vld [vmem:[%s6904_s7 + $0x10] sm:$0xff] }
 0x38f   :  { %v1366_v50 = vpop.f32.mrf.mxu0  ;;  %2111 = vmatpush.bf16.msra.mxu0 %v4972_v34  ;;  %v5009_v34 = vld [vmem:[%s6904_s7 + $0x198] sm:$0xff] }
 0x390   :  { %v1367_v52 = vadd.f32 %v1366_v50, %v1348_v47  ;;  %v4968_v47 = vld [vmem:[%s6904_s7 + $0x50] sm:$0xff]  ;;  %v1435_v50 = vld [vmem:[%s6903_s6 + $0x20] sm:$0xf] }
 0x392   :  { %v1372_v53 = vmax.f32 %v1367_v52, 0.0  ;;  %v4959_v52 = vld [vmem:[%s6904_s7 + $0x8] sm:$0xff] }
 0x393   :  { %2112 = vmatpush.bf16.msra.mxu0 %v4971_v24  ;;  %v5024_v24 = vld [vmem:[%s6904_s7 + $0x210] sm:$0xff] }
 0x394   :  { %v1375_v27 = vadd.f32 %v1374_v45, %v1372_v53  ;;  %v1386_v37 = vmul.f32 %v1372_v53, %v1372_v53  ;;  %v4969_v45 = vld [vmem:[%s6904_s7 + $0x58] sm:$0xff] }
 0x396   :  { %v1376_v51 = vrot.slane %v1375_v27, 4  ;;  %v1389_v55 = vadd.f32 %v1388_v48, %v1386_v37  ;;  %v5005_v48 = vld [vmem:[%s6904_s7 + $0x178] sm:$0xff]  ;;  %v4958_v37 = vld [vmem:[%s6904_s7] sm:$0xff] }
 0x397   :  { %2113 = vmatpush.bf16.msra.mxu0 %v4970_v41  ;;  %v5008_v41 = vld [vmem:[%s6904_s7 + $0x190] sm:$0xff] }
 0x398   :  { %v1377_v23 = vadd.f32 %v1376_v51, %v1375_v27  ;;  %v1390_v56 = vrot.slane %v1389_v55, 4  ;;  %v1455_v27 = vunpack.c.l.b16 %v1435_v50  ;;  %v4981_v51 = vld [vmem:[%s6904_s7 + $0xb8] sm:$0xff]  ;;  %v5022_v50 = vld [vmem:[%s6904_s7 + $0x200] sm:$0xff] }
 0x39a   :  { %v1378_v57 = vrot.slane %v1377_v23, 2  ;;  %v1391_v58 = vadd.f32 %v1390_v56, %v1389_v55  ;;  %v4966_v55 = vld [vmem:[%s6904_s7 + $0x40] sm:$0xff]  ;;  %v4989_v56 = vld [vmem:[%s6904_s7 + $0xf8] sm:$0xff] }
 0x39b   :  { %2114 = vmatpush.bf16.msra.mxu0 %v4969_v45 }
 0x39c   :  { %v1379_v17 = vadd.f32 %v1378_v57, %v1377_v23  ;;  %v1392_v60 = vrot.slane %v1391_v58, 2  ;;  %v1460_v23 = vpack.c.b16 %v1455_v27, %v1455_v27  ;;  %v4980_v57 = vld [vmem:[%s6904_s7 + $0xb0] sm:$0xff] }
 0x39e   :  { %v1380_v61 = vrot.slane %v1379_v17, 1  ;;  %v1393_v0 = vadd.f32 %v1392_v60, %v1391_v58  ;;  %v4988_v58 = vld [vmem:[%s6904_s7 + $0xf0] sm:$0xff]  ;;  %v4987_v60 = vld [vmem:[%s6904_s7 + $0xe8] sm:$0xff] }
 0x39f   :  { %2115 = vmatpush.bf16.msra.mxu0 %v4968_v47 }
 0x3a0   :  { %v1381_v62 = vadd.f32 %v1380_v61, %v1379_v17  ;;  %v1394_v63 = vrot.slane %v1393_v0, 1  ;;  %v4979_v17 = vld [vmem:[%s6904_s7 + $0xa8] sm:$0xff]  ;;  %v4978_v61 = vld [vmem:[%s6904_s7 + $0xa0] sm:$0xff] }
 0x3a2   :  { %v1382_v1 = vmul.f32 0.03125, %v1381_v62  ;;  %v1395_v54 = vadd.f32 %v1394_v63, %v1393_v0  ;;  %v4977_v0 = vld [vmem:[%s6904_s7 + $0x98] sm:$0xff]  ;;  %v4976_v62 = vld [vmem:[%s6904_s7 + $0x90] sm:$0xff]  ;;  %v4975_v63 = vld [vmem:[%s6904_s7 + $0x88] sm:$0xff] }
 0x3a4   :  { %v1396_v2 = vmul.f32 0.03125, %v1395_v54  ;;  %v1397_v3 = vmul.f32 %v1382_v1, %v1382_v1  ;;  %v4986_v54 = vld [vmem:[%s6904_s7 + $0xe0] sm:$0xff] }
 0x3a6   :  { %v1398_v4 = vsub.f32 %v1396_v2, %v1397_v3  ;;  %v5004_v2 = vld [vmem:[%s6904_s7 + $0x170] sm:$0xff]  ;;  %v4985_v3 = vld [vmem:[%s6904_s7 + $0xd8] sm:$0xff] }
 0x3a8   :  { %v1399_v43 = vmax.f32 %v1398_v4, 0.0  ;;  %v4984_v4 = vld [vmem:[%s6904_s7 + $0xd0] sm:$0xff] }
 0x3aa   :  { %v1400_v5 = vadd.f32 1e-05, %v1399_v43  ;;  %v4983_v43 = vld [vmem:[%s6904_s7 + $0xc8] sm:$0xff] }
 0x3ac   :  { %5177 = vrsqrt.f32 %v1400_v5  ;;  %vm1407_vm4 = vweird.f32 %v1400_v5 }
 0x3b2   :  { %v5178_v49 = vpop.eup %5177 }
 0x3b3   :  { %v1402_v6 = vmul.f32 %v5178_v49, %v1400_v5  ;;  %vm1408_vm3 = vweird.f32 %v5178_v49  ;;  %v5003_v5 = vld [vmem:[%s6904_s7 + $0x168] sm:$0xff] }
 0x3b4   :  { %vm1409_vm5 = vmor %vm1407_vm4, %vm1408_vm3 }
 0x3b5   :  { %v1403_v36 = vmul.f32 %v5178_v49, %v1402_v6  ;;  %v5002_v6 = vld [vmem:[%s6904_s7 + $0x160] sm:$0xff] }
 0x3b7   :  { %v1404_v35 = vmul.f32 0.5, %v1403_v36  ;;  %v5001_v36 = vld [vmem:[%s6904_s7 + $0x158] sm:$0xff] }
 0x3b9   :  { %v1405_v39 = vsub.f32 1.5, %v1404_v35  ;;  %v5000_v35 = vld [vmem:[%s6904_s7 + $0x150] sm:$0xff] }
 0x3bb   :  { %v1406_v28 = vmul.f32 %v5178_v49, %v1405_v39 }
 0x3bd   :  { %v1410_v8 = vsel %vm1409_vm5, %v5178_v49, %v1406_v28  ;;  %v4982_v49 = vld [vmem:[%s6904_s7 + $0xc0] sm:$0xff]  ;;  %v4997_v28 = vld [vmem:[%s6904_s7 + $0x138] sm:$0xff] }
 0x3be   :  { %v1411_v10 = vmul.f32 %v1410_v8, %v5633_v30  ;;  %v4999_v8 = vld [vmem:[%s6904_s7 + $0x148] sm:$0xff] }
 0x3c0   :  { %v1412_v11 = vperm.slane %v1411_v10, 1  ;;  %v1417_v7 = vmul.f32 %v1411_v10, %v1382_v1  ;;  %v4974_v1 = vld [vmem:[%s6904_s7 + $0x80] sm:$0xff] }
 0x3c2   :  { %v1419_v59 = vrot.slane %v1417_v7, 7  ;;  %v1415_v13 = vmul.f32 %v1412_v11, %v1371_v40  ;;  %v1413_v14 = vmul.f32 %v1412_v11, %v1369_v26  ;;  %v1416_v16 = vmul.f32 %v1412_v11, %v1372_v53  ;;  %v4965_v26 = vld [vmem:[%s6904_s7 + $0x38] sm:$0xff]  ;;  %v4962_v40 = vld [vmem:[%s6904_s7 + $0x20] sm:$0xff]  ;;  %v4967_v53 = vld [vmem:[%s6904_s7 + $0x48] sm:$0xff] }
 0x3c3   :  { %v1414_v19 = vmul.f32 %v1412_v11, %v5696_v33  ;;  %v4956_v33 = vld [vmem:[%s6903_s6 + $0x10] sm:$0xff]  ;;  %2097 = vmatpush.bf16.msra.mxu3 %v4965_v26  ;;  %2116 = vmatpush.bf16.msra.mxu0 %v4967_v53  ;;  %v4998_v11 = vld [vmem:[%s6904_s7 + $0x140] sm:$0xff]  ;;  %v5025_v26 = vld [vmem:[%s6904_s7 + $0x218] sm:$0xff] }
 0x3c4   :  { %v1421_v15 = vsub.f32 %v5633_v30, %v1419_v59  ;;  %v4955_v30 = vld [vmem:[%s6903_s6 + $0x8] sm:$0xff]  ;;  %v4996_v7 = vld [vmem:[%s6904_s7 + $0x130] sm:$0xff]  ;;  %v5029_v59 = vld [vmem:[%s6904_s7 + $0x238] sm:$0xff] }
 0x3c5   :  { %v5019_v53 = vld [vmem:[%s6904_s7 + $0x1e8] sm:$0xff] }
 0x3c6   :  { %v1422_v18 = vperm.slane %v1421_v15, 2  ;;  %v5013_v15 = vld [vmem:[%s6904_s7 + $0x1b8] sm:$0xff] }
 0x3c7   :  { %2098 = vmatpush.bf16.msra.mxu3 %v4964_v9  ;;  %2117 = vmatpush.bf16.msra.mxu0 %v4966_v55  ;;  %v4991_v9 = vld [vmem:[%s6904_s7 + $0x108] sm:$0xff]  ;;  %v5017_v55 = vld [vmem:[%s6904_s7 + $0x1d8] sm:$0xff] }
 0x3c8   :  { %v1426_v20 = vadd.f32 %v1422_v18, %v1416_v16  ;;  %v1425_v21 = vadd.f32 %v1422_v18, %v1415_v13  ;;  %v1423_v22 = vadd.f32 %v1422_v18, %v1413_v14  ;;  %v1424_v25 = vadd.f32 %v1422_v18, %v1414_v19  ;;  %v4995_v14 = vld [vmem:[%s6904_s7 + $0x128] sm:$0xff]  ;;  %v5028_v18 = vld [vmem:[%s6904_s7 + $0x230] sm:$0xff]  ;;  %v4994_v19 = vld [vmem:[%s6904_s7 + $0x120] sm:$0xff] }
 0x3ca   :  { %v1437_v29 = vpack.c.bf16 %v1426_v20, %v1425_v21  ;;  %v1436_v31 = vpack.c.bf16 %v1424_v25, %v1423_v22  ;;  %v5012_v20 = vld [vmem:[%s6904_s7 + $0x1b0] sm:$0xff]  ;;  %v5027_v21 = vld [vmem:[%s6904_s7 + $0x228] sm:$0xff]  ;;  %v4993_v25 = vld [vmem:[%s6904_s7 + $0x118] sm:$0xff] }
 0x3cb   :  { %2099 = vmatpush.bf16.msra.mxu3 %v4963_v38  ;;  %2136 = vmatpush.bf16.msrb.mxu0 %v4989_v56 }
 0x3cc   :  { %1483 = vmatpush.bf16.msra.mxu2 %v1437_v29  ;;  %v5011_v29 = vld [vmem:[%s6904_s7 + $0x1a8] sm:$0xff] }
 0x3cf   :  { %2100 = vmatpush.bf16.msra.mxu3 %v4962_v40  ;;  %2137 = vmatpush.bf16.msrb.mxu0 %v4988_v58  ;;  %v4990_v40 = vld [vmem:[%s6904_s7 + $0x100] sm:$0xff]  ;;  %v5015_v58 = vld [vmem:[%s6904_s7 + $0x1c8] sm:$0xff] }
 0x3d0   :  { %1484 = vmatpush.bf16.msra.mxu2 %v1436_v31 }
 0x3d3   :  { %3973 = vmatmul.msk.bf16.vlgmr.msra.gmra.mxu2 %vm1461_vm6, %v4954_v32  ;;  %2101 = vmatpush.bf16.msra.mxu3 %v4961_v44  ;;  %v5026_v32 = vld [vmem:[%s6904_s7 + $0x220] sm:$0xff]  ;;  %v5023_v44 = vld [vmem:[%s6904_s7 + $0x208] sm:$0xff] }
 0x3d4   :  { %2162 = vmatpush.bf16.msrb.mxu2 %v5005_v48  ;;  %2138 = vmatpush.bf16.msrb.mxu0 %v4987_v60  ;;  %v5020_v48 = vld [vmem:[%s6904_s7 + $0x1f0] sm:$0xff]  ;;  %v5014_v60 = vld [vmem:[%s6904_s7 + $0x1c0] sm:$0xff] }
 0x3d7   :  { %2102 = vmatpush.bf16.msra.mxu3 %v4960_v46  ;;  %v5007_v46 = vld [vmem:[%s6904_s7 + $0x188] sm:$0xff] }
 0x3d8   :  { %2139 = vmatpush.bf16.msrb.mxu0 %v4986_v54  ;;  %2163 = vmatpush.bf16.msrb.mxu2 %v5004_v2  ;;  %v5094_v54 = vld [vmem:[%s6905_s10 + $0x1f4] sm:$0xf0] }
 0x3db   :  { %2103 = vmatpush.bf16.msra.mxu3 %v4959_v52  ;;  %v5006_v52 = vld [vmem:[%s6904_s7 + $0x180] sm:$0xff] }
 0x3dc   :  { %2140 = vmatpush.bf16.msrb.mxu0 %v4985_v3  ;;  %2164 = vmatpush.bf16.msrb.mxu2 %v5003_v5 }
 0x3df   :  { %2104 = vmatpush.bf16.msra.mxu3 %v4958_v37 }
 0x3e0   :  { %2141 = vmatpush.bf16.msrb.mxu0 %v4984_v4  ;;  %2165 = vmatpush.bf16.msrb.mxu2 %v5002_v6 }
 0x3e3   :  { %3974 = vmatmul.msk.bf16.gmra.mxu2 %vm1461_vm6, %v4955_v30  ;;  %2123 = vmatpush.bf16.msrb.mxu3 %v4981_v51  ;;  %v4992_v30 = vld [vmem:[%s6904_s7 + $0x110] sm:$0xff]  ;;  %v5018_v51 = vld [vmem:[%s6904_s7 + $0x1e0] sm:$0xff] }
 0x3e4   :  { %2142 = vmatpush.bf16.msrb.mxu0 %v4983_v43  ;;  %2166 = vmatpush.bf16.msrb.mxu2 %v5001_v36  ;;  %v4514_v36 = vld [vmem:[%s6905_s10 + $0x1e0] sm:$0xf] }
 0x3e7   :  { %2124 = vmatpush.bf16.msrb.mxu3 %v4980_v57  ;;  %v5016_v57 = vld [vmem:[%s6904_s7 + $0x1d0] sm:$0xff] }
 0x3e8   :  { %2143 = vmatpush.bf16.msrb.mxu0 %v4982_v49  ;;  %2167 = vmatpush.bf16.msrb.mxu2 %v5000_v35  ;;  %v5092_v35 = vld [vmem:[%s6905_s10 + $0x1e4] sm:$0xf0] }
 0x3eb   :  { %2125 = vmatpush.bf16.msrb.mxu3 %v4979_v17 }
 0x3ec   :  { %2168 = vmatpush.bf16.msrb.mxu2 %v4999_v8 }
 0x3ef   :  { %2126 = vmatpush.bf16.msrb.mxu3 %v4978_v61 }
 0x3f0   :  { %2169 = vmatpush.bf16.msrb.mxu2 %v4998_v11  ;;  %v5955_v11 = vld [vmem:[%s6906_s8] sm:$0x7] }
 0x3f3   :  { %3975 = vmatmul.msk.bf16.gmra.mxu2 %vm1461_vm6, %v4956_v33  ;;  %2127 = vmatpush.bf16.msrb.mxu3 %v4977_v0  ;;  %v5010_v33 = vld [vmem:[%s6904_s7 + $0x1a0] sm:$0xff] }
 0x3f4   :  { %2201 = vmatpush.bf16.msra.mxu2 %v5029_v59 }
 0x3f7   :  { %2128 = vmatpush.bf16.msrb.mxu3 %v4976_v62 }
 0x3f8   :  { %2202 = vmatpush.bf16.msra.mxu2 %v5028_v18 }
 0x3fb   :  { %2129 = vmatpush.bf16.msrb.mxu3 %v4975_v63 }
 0x3fc   :  { %2203 = vmatpush.bf16.msra.mxu2 %v5027_v21  ;;  %v4506_v21 = vld [vmem:[%s6905_s10 + $0x1d0] sm:$0xf] }
 0x3ff   :  { %2130 = vmatpush.bf16.msrb.mxu3 %v4974_v1  ;;  %v4522_v1 = vld [vmem:[%s6905_s10 + $0x1f0] sm:$0xf] }
 0x400   :  { %2204 = vmatpush.bf16.msra.mxu2 %v5026_v32  ;;  %v4523_v2 = vor.u32 %v5094_v54, %v4522_v1 }
 0x402   :  { %3229 = vmatpush.bf16.msrb.mxu1 %v4523_v2 }
 0x403   :  { %3976 = vmatmul.msk.bf16.gmra.mxu2 %vm1461_vm6, %v4957_v42  ;;  %v5021_v42 = vld [vmem:[%s6904_s7 + $0x1f8] sm:$0xff] }
 0x404   :  { %2205 = vmatpush.bf16.msra.mxu2 %v5025_v26 }
 0x408   :  { %2206 = vmatpush.bf16.msra.mxu2 %v5024_v24 }
 0x40c   :  { %2207 = vmatpush.bf16.msra.mxu2 %v5023_v44 }
 0x410   :  { %2208 = vmatpush.bf16.msra.mxu2 %v5022_v50 }
 0x413   :  { %3977 = vmatmul.msk.bf16.gmra.mxu2 %vm1461_vm6, %v1460_v23 }
 0x456   :  { %v1486_v39 = vpop.f32.mrf.mxu2 }
 0x457   :  { %v1510_v10 = vpack.c.bf16 %v1486_v39, %v1486_v39  ;;  %v4515_v39 = vor.u32 %v5092_v35, %v4514_v36  ;;  %v4482_v36 = vld [vmem:[%s6905_s10 + $0x1a0] sm:$0xf]  ;;  %v5084_v35 = vld [vmem:[%s6905_s10 + $0x1a4] sm:$0xf0] }
 0x459   :  { %2105 = vmatmul.bf16.vlgmr.msra.gmra.mxu3 %v1510_v10  ;;  %3230 = vmatpush.bf16.msrb.mxu1 %v4515_v39  ;;  %v4330_v39 = vld [vmem:[%s6905_s10 + $0x70] sm:$0xf] }
 0x45a   :  { %2149 = vmatpush.bf16.msra.mxu3 %v4997_v28 }
 0x45e   :  { %2150 = vmatpush.bf16.msra.mxu3 %v4996_v7  ;;  %v1488_v13 = vpop.f32.mrf.mxu2  ;;  %v1664_v7 = vperm.slane %v5955_v11, 0 }
 0x45f   :  { %v1511_v16 = vpack.c.bf16 %v1488_v13, %v1488_v13 }
 0x461   :  { %2118 = vmatmul.bf16.vlgmr.msra.gmra.mxu0 %v1511_v16 }
 0x462   :  { %2151 = vmatpush.bf16.msra.mxu3 %v4995_v14  ;;  %2175 = vmatpush.bf16.msra.mxu0 %v5013_v15 }
 0x466   :  { %2152 = vmatpush.bf16.msra.mxu3 %v4994_v19  ;;  %v1491_v22 = vpop.f32.mrf.mxu2  ;;  %2176 = vmatpush.bf16.msra.mxu0 %v5012_v20 }
 0x467   :  { %v1512_v31 = vpack.c.bf16 %v1491_v22, %v1491_v22  ;;  %v5090_v22 = vld [vmem:[%s6905_s10 + $0x1d4] sm:$0xf0] }
 0x469   :  { %2131 = vmatmul.bf16.vlgmr.msrb.gmra.mxu3 %v1512_v31 }
 0x46a   :  { %2153 = vmatpush.bf16.msra.mxu3 %v4993_v25  ;;  %2177 = vmatpush.bf16.msra.mxu0 %v5011_v29  ;;  %v4507_v25 = vor.u32 %v5090_v22, %v4506_v21  ;;  %v4458_v21 = vld [vmem:[%s6905_s10 + $0x170] sm:$0xf] }
 0x46c   :  { %3231 = vmatpush.bf16.msrb.mxu1 %v4507_v25 }
 0x46e   :  { %2154 = vmatpush.bf16.msra.mxu3 %v4992_v30  ;;  %v1493_v12 = vpop.f32.mrf.mxu2  ;;  %2178 = vmatpush.bf16.msra.mxu0 %v5010_v33 }
 0x46f   :  { %v1513_v38 = vpack.c.bf16 %v1493_v12, %v1493_v12 }
 0x471   :  { %2144 = vmatmul.bf16.vlgmr.msrb.gmra.mxu0 %v1513_v38 }
 0x472   :  { %2155 = vmatpush.bf16.msra.mxu3 %v4991_v9  ;;  %2179 = vmatpush.bf16.msra.mxu0 %v5009_v34 }
 0x476   :  { %2156 = vmatpush.bf16.msra.mxu3 %v4990_v40  ;;  %v1496_v45 = vpop.f32.mrf.mxu2  ;;  %2180 = vmatpush.bf16.msra.mxu0 %v5008_v41 }
 0x477   :  { %v1514_v47 = vpack.c.bf16 %v1496_v45, %v1496_v45 }
 0x479   :  { %2157 = vmatmul.bf16.vlgmr.msra.gmra.mxu3 %v1514_v47 }
 0x47a   :  { %2188 = vmatpush.bf16.msrb.mxu3 %v5021_v42  ;;  %2181 = vmatpush.bf16.msra.mxu0 %v5007_v46 }
 0x47e   :  { %2189 = vmatpush.bf16.msrb.mxu3 %v5020_v48  ;;  %v1498_v27 = vpop.f32.mrf.mxu2  ;;  %2182 = vmatpush.bf16.msra.mxu0 %v5006_v52 }
 0x47f   :  { %v1515_v37 = vpack.c.bf16 %v1498_v27, %v1498_v27 }
 0x481   :  { %2170 = vmatmul.bf16.vlgmr.msrb.gmra.mxu2 %v1515_v37 }
 0x482   :  { %2190 = vmatpush.bf16.msrb.mxu3 %v5019_v53 }
 0x486   :  { %2191 = vmatpush.bf16.msrb.mxu3 %v5018_v51  ;;  %v1501_v23 = vpop.f32.mrf.mxu2 }
 0x487   :  { %v1516_v56 = vpack.c.bf16 %v1501_v23, %v1501_v23 }
 0x489   :  { %2183 = vmatmul.bf16.vlgmr.msra.gmra.mxu0 %v1516_v56 }
 0x48a   :  { %2192 = vmatpush.bf16.msrb.mxu3 %v5017_v55 }
 0x48e   :  { %2193 = vmatpush.bf16.msrb.mxu3 %v5016_v57  ;;  %v1503_v17 = vpop.f32.mrf.mxu2 }
 0x48f   :  { %v1517_v61 = vpack.c.bf16 %v1503_v17, %v1503_v17  ;;  %v4498_v17 = vld [vmem:[%s6905_s10 + $0x1c0] sm:$0xf] }
 0x492   :  { %2194 = vmatpush.bf16.msrb.mxu3 %v5015_v58 }
 0x496   :  { %2195 = vmatpush.bf16.msrb.mxu3 %v5014_v60  ;;  %v1506_v0 = vpop.f32.mrf.mxu2  ;;  %v5088_v60 = vld [vmem:[%s6905_s10 + $0x1c4] sm:$0xf0] }
 0x497   :  { %v1518_v62 = vpack.c.bf16 %v1506_v0, %v1506_v0 }
 0x499   :  { %2196 = vmatmul.bf16.vlgmr.msrb.gmra.mxu3 %v1517_v61  ;;  %2209 = vmatmul.bf16.vlgmr.msra.gmra.mxu2 %v1518_v62  ;;  %v4499_v61 = vor.u32 %v5088_v60, %v4498_v17  ;;  %v5082_v60 = vld [vmem:[%s6905_s10 + $0x194] sm:$0xf0] }
 0x49b   :  { %3232 = vmatpush.bf16.msrb.mxu1 %v4499_v61 }
 0x49e   :  { %v1508_v63 = vpop.f32.mrf.mxu2 }
 0x4dc   :  { %v2106_v3 = vpop.f32.mrf.mxu3 }
 0x4dd   :  { %v2107_v15 = vadd.f32 %v2106_v3, %v1664_v7  ;;  %v4394_v7 = vld [vmem:[%s6905_s10 + $0xf0] sm:$0xf] }
 0x4de   :  { %v2119_v4 = vpop.f32.mrf.mxu0 }
 0x4df   :  { %v2120_v16 = vadd.f32 %v2119_v4, %v2107_v15 }
 0x4e4   :  { %v2108_v43 = vpop.f32.mrf.mxu3 }
 0x4e6   :  { %v2121_v5 = vpop.f32.mrf.mxu0 }
 0x4e7   :  { %v4490_v5 = vld [vmem:[%s6905_s10 + $0x1b0] sm:$0xf] }
 0x4ec   :  { %v2132_v49 = vpop.f32.mrf.mxu3 }
 0x4ed   :  { %v2133_v19 = vadd.f32 %v2132_v49, %v2120_v16  ;;  %v5086_v49 = vld [vmem:[%s6905_s10 + $0x1b4] sm:$0xf0] }
 0x4ee   :  { %v2145_v6 = vpop.f32.mrf.mxu0 }
 0x4ef   :  { %v2146_v29 = vadd.f32 %v2145_v6, %v2133_v19  ;;  %v4491_v6 = vor.u32 %v5086_v49, %v4490_v5  ;;  %v5044_v19 = vld [vmem:[%s6905_s10 + $0x64] sm:$0xf0] }
 0x4f0   :  { %v5080_v5 = vld [vmem:[%s6905_s10 + $0x184] sm:$0xf0] }
 0x4f1   :  { %3233 = vmatpush.bf16.msrb.mxu1 %v4491_v6  ;;  %v2256_v49 = vld [vmem:[%s6907_s9 + $0x8] sm:$0x1]  ;;  %v4426_v6 = vld [vmem:[%s6905_s10 + $0x130] sm:$0xf] }
 0x4f4   :  { %v2134_v28 = vpop.f32.mrf.mxu3 }
 0x4f6   :  { %v2147_v8 = vpop.f32.mrf.mxu0 }
 0x4fc   :  { %v2158_v10 = vpop.f32.mrf.mxu3 }
 0x4fd   :  { %v2159_v31 = vadd.f32 %v2158_v10, %v2146_v29  ;;  %v5046_v10 = vld [vmem:[%s6905_s10 + $0x74] sm:$0xf0] }
 0x504   :  { %v2160_v59 = vpop.f32.mrf.mxu3  ;;  %v2171_v13 = vpop.f32.mrf.mxu2 }
 0x505   :  { %v2172_v32 = vadd.f32 %v2171_v13, %v2159_v31  ;;  %v4483_v59 = vor.u32 %v5084_v35, %v4482_v36  ;;  %v4331_v13 = vor.u32 %v5046_v10, %v4330_v39  ;;  %v4282_v35 = vld [vmem:[%s6905_s10 + $0x10] sm:$0xf]  ;;  %v5034_v10 = vld [vmem:[%s6905_s10 + $0x14] sm:$0xf0] }
 0x506   :  { %v2184_v14 = vpop.f32.mrf.mxu0 }
 0x507   :  { %v2185_v30 = vadd.f32 %v2184_v14, %v2172_v32  ;;  %v5062_v14 = vld [vmem:[%s6905_s10 + $0xf4] sm:$0xf0]  ;;  %3190 = vmatpush.bf16.msra.mxu3 %v4331_v13  ;;  %v4314_v32 = vld [vmem:[%s6905_s10 + $0x50] sm:$0xf]  ;;  %3234 = vmatpush.bf16.msrb.mxu1 %v4483_v59 }
 0x508   :  { %v4395_v16 = vor.u32 %v5062_v14, %v4394_v7  ;;  %v4778_v7 = vld [vmem:[%s6905_s10 + $0x3f0] sm:$0xf]  ;;  %v5158_v59 = vld [vmem:[%s6905_s10 + $0x3f4] sm:$0xf0] }
 0x509   :  { %v5070_v13 = vld [vmem:[%s6905_s10 + $0x134] sm:$0xf0]  ;;  %v4346_v14 = vld [vmem:[%s6905_s10 + $0x90] sm:$0xf] }
 0x50a   :  { %3203 = vmatpush.bf16.msrb.mxu0 %v4395_v16  ;;  %v4779_v16 = vor.u32 %v5158_v59, %v4778_v7  ;;  %v4626_v59 = vld [vmem:[%s6905_s10 + $0x2c0] sm:$0xf] }
 0x50c   :  { %v2173_v18 = vpop.f32.mrf.mxu2 }
 0x50d   :  { %v4322_v18 = vld [vmem:[%s6905_s10 + $0x60] sm:$0xf] }
 0x50e   :  { %v2186_v20 = vpop.f32.mrf.mxu0  ;;  %v4323_v22 = vor.u32 %v5044_v19, %v4322_v18  ;;  %v2263_v18 = vunpack.c.l.b16 %v2256_v49  ;;  %v4770_v19 = vld [vmem:[%s6905_s10 + $0x3e0] sm:$0xf] }
 0x50f   :  { %v4386_v20 = vld [vmem:[%s6905_s10 + $0xe0] sm:$0xf] }
 0x510   :  { %3191 = vmatpush.bf16.msra.mxu3 %v4323_v22  ;;  %v4283_v22 = vor.u32 %v5034_v10, %v4282_v35  ;;  %v5140_v10 = vld [vmem:[%s6905_s10 + $0x364] sm:$0xf0] }
 0x51c   :  { %v2197_v33 = vpop.f32.mrf.mxu3  ;;  %v2210_v12 = vpop.f32.mrf.mxu2 }
 0x51d   :  { %v2198_v26 = vadd.f32 %v2197_v33, %v2185_v30  ;;  %v5042_v30 = vld [vmem:[%s6905_s10 + $0x54] sm:$0xf0] }
 0x51e   :  { %v5078_v33 = vld [vmem:[%s6905_s10 + $0x174] sm:$0xf0] }
 0x51f   :  { %v2211_v9 = vadd.f32 %v2210_v12, %v2198_v26  ;;  %v4378_v26 = vld [vmem:[%s6905_s10 + $0xd0] sm:$0xf]  ;;  %v5058_v12 = vld [vmem:[%s6905_s10 + $0xd4] sm:$0xf0] }
 0x521   :  { %v2214_v34 = vmax.f32 %v2211_v9, 0.0 }
 0x523   :  { %v2215_v38 = vrot.slane %v2214_v34, 4  ;;  %v2222_v24 = vmul.f32 %v2214_v34, %v2214_v34 }
 0x524   :  { %v2199_v40 = vpop.f32.mrf.mxu3  ;;  %v2212_v44 = vpop.f32.mrf.mxu2 }
 0x525   :  { %v2216_v41 = vadd.f32 %v2215_v38, %v2214_v34  ;;  %v2223_v42 = vrot.slane %v2222_v24, 4  ;;  %v4450_v40 = vld [vmem:[%s6905_s10 + $0x160] sm:$0xf]  ;;  %v5040_v44 = vld [vmem:[%s6905_s10 + $0x44] sm:$0xf0] }
 0x527   :  { %v2217_v45 = vrot.slane %v2216_v41, 2  ;;  %v2224_v46 = vadd.f32 %v2223_v42, %v2222_v24  ;;  %v4459_v24 = vor.u32 %v5078_v33, %v4458_v21  ;;  %v4306_v42 = vld [vmem:[%s6905_s10 + $0x40] sm:$0xf]  ;;  %v5068_v21 = vld [vmem:[%s6905_s10 + $0x124] sm:$0xf0] }
 0x529   :  { %v2218_v47 = vadd.f32 %v2217_v45, %v2216_v41  ;;  %v2225_v48 = vrot.slane %v2224_v46, 2  ;;  %v4379_v41 = vor.u32 %v5058_v12, %v4378_v26  ;;  %v5076_v45 = vld [vmem:[%s6905_s10 + $0x164] sm:$0xf0]  ;;  %v5110_v26 = vld [vmem:[%s6905_s10 + $0x274] sm:$0xf0] }
 0x52a   :  { %v4762_v12 = vld [vmem:[%s6905_s10 + $0x3d0] sm:$0xf] }
 0x52b   :  { %v2219_v50 = vrot.slane %v2218_v47, 1  ;;  %v2226_v52 = vadd.f32 %v2225_v48, %v2224_v46  ;;  %v4370_v46 = vld [vmem:[%s6905_s10 + $0xc0] sm:$0xf] }
 0x52d   :  { %v2220_v53 = vadd.f32 %v2219_v50, %v2218_v47  ;;  %v2227_v27 = vrot.slane %v2226_v52, 1  ;;  %v5056_v47 = vld [vmem:[%s6905_s10 + $0xc4] sm:$0xf0]  ;;  %v5030_v50 = vld [vmem:[%s6907_s9] sm:$0xff] }
 0x52f   :  { %v2228_v37 = vadd.f32 %v2227_v27, %v2226_v52  ;;  %v2221_v51 = vmul.f32 0.125, %v2220_v53  ;;  %v4307_v52 = vor.u32 %v5040_v44, %v4306_v42  ;;  %v4451_v53 = vor.u32 %v5076_v45, %v4450_v40  ;;  %v4442_v27 = vld [vmem:[%s6905_s10 + $0x150] sm:$0xf]  ;;  %v5126_v42 = vld [vmem:[%s6905_s10 + $0x2f4] sm:$0xf0] }
 0x531   :  { %v2229_v55 = vmul.f32 0.125, %v2228_v37  ;;  %v2230_v23 = vmul.f32 %v2221_v51, %v2221_v51  ;;  %v4371_v37 = vor.u32 %v5056_v47, %v4370_v46  ;;  %v4410_v46 = vld [vmem:[%s6905_s10 + $0x110] sm:$0xf] }
 0x533   :  { %v2231_v56 = vsub.f32 %v2229_v55, %v2230_v23  ;;  %v5038_v55 = vld [vmem:[%s6905_s10 + $0x34] sm:$0xf0] }
 0x534   :  { %v5074_v23 = vld [vmem:[%s6905_s10 + $0x154] sm:$0xf0] }
 0x535   :  { %v2232_v57 = vmax.f32 %v2231_v56, 0.0  ;;  %v4362_v56 = vld [vmem:[%s6905_s10 + $0xb0] sm:$0xf]  ;;  %v4443_v61 = vor.u32 %v5074_v23, %v4442_v27  ;;  %v4578_v27 = vld [vmem:[%s6905_s10 + $0x260] sm:$0xf] }
 0x536   :  { %v5124_v23 = vld [vmem:[%s6905_s10 + $0x2e4] sm:$0xf0] }
 0x537   :  { %v2233_v58 = vadd.f32 1e-05, %v2232_v57  ;;  %v5054_v57 = vld [vmem:[%s6905_s10 + $0xb4] sm:$0xf0] }
 0x539   :  { %5179 = vrsqrt.f32 %v2233_v58  ;;  %vm2240_vm8 = vweird.f32 %v2233_v58 }
 0x53f   :  { %v5180_v0 = vpop.eup %5179 }
 0x540   :  { %v2235_v62 = vmul.f32 %v5180_v0, %v2233_v58  ;;  %vm2241_vm7 = vweird.f32 %v5180_v0  ;;  %v4474_v58 = vld [vmem:[%s6905_s10 + $0x190] sm:$0xf] }
 0x541   :  { %vm2242_vm9 = vmor %vm2240_vm8, %vm2241_vm7 }
 0x542   :  { %v2236_v63 = vmul.f32 %v5180_v0, %v2235_v62  ;;  %v4363_v62 = vor.u32 %v5054_v57, %v4362_v56 }
 0x544   :  { %v2237_v1 = vmul.f32 0.5, %v2236_v63  ;;  %v4290_v63 = vld [vmem:[%s6905_s10 + $0x20] sm:$0xf] }
 0x546   :  { %v2238_v54 = vsub.f32 1.5, %v2237_v1  ;;  %v5036_v1 = vld [vmem:[%s6905_s10 + $0x24] sm:$0xf0] }
 0x547   :  { %v4291_v36 = vor.u32 %v5036_v1, %v4290_v63  ;;  %v5106_v63 = vld [vmem:[%s6905_s10 + $0x254] sm:$0xf0]  ;;  %v4714_v1 = vld [vmem:[%s6905_s10 + $0x370] sm:$0xf] }
 0x548   :  { %v2239_v2 = vmul.f32 %v5180_v0, %v2238_v54  ;;  %v4475_v54 = vor.u32 %v5082_v60, %v4474_v58  ;;  %v4402_v58 = vld [vmem:[%s6905_s10 + $0x100] sm:$0xf]  ;;  %v4746_v60 = vld [vmem:[%s6905_s10 + $0x3b0] sm:$0xf] }
 0x54a   :  { %v2243_v3 = vsel %vm2242_vm9, %v5180_v0, %v2239_v2  ;;  %v4434_v0 = vld [vmem:[%s6905_s10 + $0x140] sm:$0xf]  ;;  %v5072_v2 = vld [vmem:[%s6905_s10 + $0x144] sm:$0xf0]  ;;  %3235 = vmatpush.bf16.msrb.mxu1 %v4475_v54  ;;  %v5142_v54 = vld [vmem:[%s6905_s10 + $0x374] sm:$0xf0] }
 0x54b   :  { %v2244_v4 = vmul.f32 %v2243_v3, %v5955_v11  ;;  %v4354_v3 = vld [vmem:[%s6905_s10 + $0xa0] sm:$0xf]  ;;  %v4715_v35 = vor.u32 %v5142_v54, %v4714_v1  ;;  %v5128_v54 = vld [vmem:[%s6905_s10 + $0x304] sm:$0xf0] }
 0x54c   :  { %v4658_v1 = vld [vmem:[%s6905_s10 + $0x300] sm:$0xf] }
 0x54d   :  { %v2247_v43 = vmul.f32 %v2244_v4, %v2221_v51  ;;  %v2245_v28 = vperm.slane %v2244_v4, 1  ;;  %v4298_v51 = vld [vmem:[%s6905_s10 + $0x30] sm:$0xf]  ;;  %v5052_v4 = vld [vmem:[%s6905_s10 + $0xa4] sm:$0xf0] }
 0x54e   :  { %v4299_v17 = vor.u32 %v5038_v55, %v4298_v51  ;;  %v4642_v55 = vld [vmem:[%s6905_s10 + $0x2e0] sm:$0xf] }
 0x54f   :  { %v2249_v8 = vrot.slane %v2247_v43, 7  ;;  %v2246_v25 = vmul.f32 %v2245_v28, %v2214_v34  ;;  %v4315_v34 = vor.u32 %v5042_v30, %v4314_v32  ;;  %v4466_v43 = vld [vmem:[%s6905_s10 + $0x180] sm:$0xf]  ;;  %v4435_v28 = vor.u32 %v5072_v2, %v4434_v0  ;;  %v5032_v32 = vld [vmem:[%s6905_s10 + $0x4] sm:$0xf0] }
 0x550   :  { %v4467_v39 = vor.u32 %v5080_v5, %v4466_v43  ;;  %v4586_v30 = vld [vmem:[%s6905_s10 + $0x270] sm:$0xf]  ;;  %v5064_v0 = vld [vmem:[%s6905_s10 + $0x104] sm:$0xf0]  ;;  %v4643_v2 = vor.u32 %v5124_v23, %v4642_v55  ;;  %v5130_v55 = vld [vmem:[%s6905_s10 + $0x314] sm:$0xf0] }
 0x551   :  { %v2251_v15 = vsub.f32 %v5955_v11, %v2249_v8  ;;  %v5060_v11 = vld [vmem:[%s6905_s10 + $0xe4] sm:$0xf0]  ;;  %3192 = vmatpush.bf16.msra.mxu3 %v4315_v34  ;;  %v4355_v8 = vor.u32 %v5052_v4, %v4354_v3  ;;  %v2265_v34 = vpack.c.b16 %v2263_v18, %v2263_v18  ;;  %v4587_v47 = vor.u32 %v5110_v26, %v4586_v30  ;;  %v4634_v3 = vld [vmem:[%s6905_s10 + $0x2d0] sm:$0xf]  ;;  %v5122_v4 = vld [vmem:[%s6905_s10 + $0x2d4] sm:$0xf0] }
 0x552   :  { %v4387_v31 = vor.u32 %v5060_v11, %v4386_v20  ;;  %3236 = vmatpush.bf16.msrb.mxu1 %v4467_v39  ;;  %v4418_v20 = vld [vmem:[%s6905_s10 + $0x120] sm:$0xf]  ;;  %v5156_v11 = vld [vmem:[%s6905_s10 + $0x3e4] sm:$0xf0]  ;;  %v4403_v5 = vor.u32 %v5064_v0, %v4402_v58  ;;  %v4635_v7 = vor.u32 %v5122_v4, %v4634_v3  ;;  %v4554_v18 = vld [vmem:[%s6905_s10 + $0x230] sm:$0xf]  ;;  %v4659_v3 = vor.u32 %v5128_v54, %v4658_v1 }
 0x553   :  { %v2252_v29 = vperm.slane %v2251_v15, 2  ;;  %v5050_v15 = vld [vmem:[%s6905_s10 + $0x94] sm:$0xf0]  ;;  %v4771_v33 = vor.u32 %v5156_v11, %v4770_v19  ;;  %v4419_v45 = vor.u32 %v5068_v21, %v4418_v20  ;;  %v4562_v39 = vld [vmem:[%s6905_s10 + $0x240] sm:$0xf] }
 0x554   :  { %3204 = vmatpush.bf16.msrb.mxu0 %v4387_v31  ;;  %v4274_v31 = vld [vmem:[%s6905_s10] sm:$0xf]  ;;  %v5102_v19 = vld [vmem:[%s6905_s10 + $0x234] sm:$0xf0]  ;;  %v4698_v20 = vld [vmem:[%s6905_s10 + $0x350] sm:$0xf] }
 0x555   :  { %v2253_v9 = vadd.f32 %v2252_v29, %v2246_v25  ;;  %3193 = vmatpush.bf16.msra.mxu3 %v4307_v52  ;;  %v4427_v25 = vor.u32 %v5070_v13, %v4426_v6  ;;  %v4347_v29 = vor.u32 %v5050_v15, %v4346_v14  ;;  %v4275_v40 = vor.u32 %v5032_v32, %v4274_v31  ;;  %v5066_v52 = vld [vmem:[%s6905_s10 + $0x114] sm:$0xf0]  ;;  %v4738_v6 = vld [vmem:[%s6905_s10 + $0x3a0] sm:$0xf]  ;;  %v5120_v13 = vld [vmem:[%s6905_s10 + $0x2c4] sm:$0xf0] }
 0x556   :  { %3281 = vmatpush.bf16.msra.mxu1 %v4779_v16  ;;  %v4411_v57 = vor.u32 %v5066_v52, %v4410_v46  ;;  %v5138_v21 = vld [vmem:[%s6905_s10 + $0x354] sm:$0xf0]  ;;  %v4618_v11 = vld [vmem:[%s6905_s10 + $0x2b0] sm:$0xf]  ;;  %v4546_v32 = vld [vmem:[%s6905_s10 + $0x220] sm:$0xf] }
 0x557   :  { %v2257_v38 = vpack.c.bf16 %v2253_v9, %v2253_v9  ;;  %v5154_v9 = vld [vmem:[%s6905_s10 + $0x3d4] sm:$0xf0]  ;;  %v4699_v31 = vor.u32 %v5138_v21, %v4698_v20  ;;  %v5100_v30 = vld [vmem:[%s6905_s10 + $0x224] sm:$0xf0]  ;;  %v4730_v23 = vld [vmem:[%s6905_s10 + $0x390] sm:$0xf] }
 0x558   :  { %3205 = vmatpush.bf16.msrb.mxu0 %v4379_v41  ;;  %v4650_v41 = vld [vmem:[%s6905_s10 + $0x2f0] sm:$0xf]  ;;  %v4763_v44 = vor.u32 %v5154_v9, %v4762_v12  ;;  %v5136_v26 = vld [vmem:[%s6905_s10 + $0x344] sm:$0xf0]  ;;  %v4610_v9 = vld [vmem:[%s6905_s10 + $0x2a0] sm:$0xf] }
 0x559   :  { %v2275_v48 = vsel %vm2273_vm10, %v2257_v38, 0  ;;  %3194 = vmatpush.bf16.msra.mxu3 %v4299_v17  ;;  %v4338_v38 = vld [vmem:[%s6905_s10 + $0x80] sm:$0xf]  ;;  %v4651_v51 = vor.u32 %v5126_v42, %v4650_v41  ;;  %v5098_v41 = vld [vmem:[%s6905_s10 + $0x214] sm:$0xf0] }
 0x55a   :  { %2284 = vmatpush.bf16.msrb.mxu2 %v2275_v48  ;;  %3282 = vmatpush.bf16.msra.mxu1 %v4771_v33  ;;  %v4754_v48 = vld [vmem:[%s6905_s10 + $0x3c0] sm:$0xf]  ;;  %v4682_v42 = vld [vmem:[%s6905_s10 + $0x330] sm:$0xf]  ;;  %v5144_v4 = vld [vmem:[%s6905_s10 + $0x384] sm:$0xf0] }
 0x55b   :  { %v4690_v33 = vld [vmem:[%s6905_s10 + $0x340] sm:$0xf] }
 0x55c   :  { %3206 = vmatpush.bf16.msrb.mxu0 %v4371_v37  ;;  %v5108_v37 = vld [vmem:[%s6905_s10 + $0x264] sm:$0xf0]  ;;  %v4594_v0 = vld [vmem:[%s6905_s10 + $0x280] sm:$0xf] }
 0x55d   :  { %4270 = vmatmul.msk.bf16.vlgmr.msrb.gmra.mxu2 %vm2266_vm11, %v5030_v50  ;;  %3195 = vmatpush.bf16.msra.mxu3 %v4291_v36  ;;  %v5152_v50 = vld [vmem:[%s6905_s10 + $0x3c4] sm:$0xf0]  ;;  %v4579_v17 = vor.u32 %v5108_v37, %v4578_v27  ;;  %v5114_v27 = vld [vmem:[%s6905_s10 + $0x294] sm:$0xf0]  ;;  %v4666_v37 = vld [vmem:[%s6905_s10 + $0x310] sm:$0xf] }
 0x55e   :  { %3216 = vmatpush.bf16.msra.mxu2 %v4459_v24  ;;  %v5048_v24 = vld [vmem:[%s6905_s10 + $0x84] sm:$0xf0]  ;;  %3283 = vmatpush.bf16.msra.mxu1 %v4763_v44  ;;  %v4755_v56 = vor.u32 %v5152_v50, %v4754_v48  ;;  %v5134_v44 = vld [vmem:[%s6905_s10 + $0x334] sm:$0xf0]  ;;  %v4674_v48 = vld [vmem:[%s6905_s10 + $0x320] sm:$0xf] }
 0x55f   :  { %v5148_v36 = vld [vmem:[%s6905_s10 + $0x3a4] sm:$0xf0] }
 0x560   :  { %3207 = vmatpush.bf16.msrb.mxu0 %v4363_v62  ;;  %v4570_v62 = vld [vmem:[%s6905_s10 + $0x250] sm:$0xf]  ;;  %v4739_v14 = vor.u32 %v5148_v36, %v4738_v6  ;;  %v5132_v50 = vld [vmem:[%s6905_s10 + $0x324] sm:$0xf0]  ;;  %v5045_v6 = vld [vmem:[%s6905_s10 + $0x74] sm:$0xf] }
 0x561   :  { %3196 = vmatpush.bf16.msra.mxu3 %v4283_v22  ;;  %v4571_v49 = vor.u32 %v5106_v63, %v4570_v62  ;;  %v4627_v22 = vor.u32 %v5120_v13, %v4626_v59  ;;  %v4675_v52 = vor.u32 %v5132_v50, %v4674_v48  ;;  %v5112_v62 = vld [vmem:[%s6905_s10 + $0x284] sm:$0xf0]  ;;  %v4332_v36 = vld [vmem:[%s6905_s10 + $0x78] sm:$0xf0]  ;;  %v4834_v59 = vld [vmem:[%s6905_s10 + $0x460] sm:$0xf] }
 0x562   :  { %3217 = vmatpush.bf16.msra.mxu2 %v4451_v53  ;;  %v4339_v53 = vor.u32 %v5048_v24, %v4338_v38  ;;  %3284 = vmatpush.bf16.msra.mxu1 %v4755_v56  ;;  %v4547_v38 = vor.u32 %v5100_v30, %v4546_v32  ;;  %v4691_v24 = vor.u32 %v5136_v26, %v4690_v33  ;;  %v5146_v56 = vld [vmem:[%s6905_s10 + $0x394] sm:$0xf0]  ;;  %v5059_v32 = vld [vmem:[%s6905_s10 + $0xe4] sm:$0xf]  ;;  %v4388_v33 = vld [vmem:[%s6905_s10 + $0xe8] sm:$0xf0] }
 0x563   :  { %v4731_v58 = vor.u32 %v5146_v56, %v4730_v23  ;;  %v4595_v63 = vor.u32 %v5112_v62, %v4594_v0  ;;  %v5075_v26 = vld [vmem:[%s6905_s10 + $0x164] sm:$0xf]  ;;  %v5073_v48 = vld [vmem:[%s6905_s10 + $0x154] sm:$0xf]  ;;  %v4444_v50 = vld [vmem:[%s6905_s10 + $0x158] sm:$0xf0] }
 0x564   :  { %3208 = vmatpush.bf16.msrb.mxu0 %v4355_v8  ;;  %v4706_v8 = vld [vmem:[%s6905_s10 + $0x360] sm:$0xf]  ;;  %v4308_v23 = vld [vmem:[%s6905_s10 + $0x48] sm:$0xf0]  ;;  %v5055_v56 = vld [vmem:[%s6905_s10 + $0xc4] sm:$0xf] }
 0x565   :  { %3197 = vmatpush.bf16.msra.mxu3 %v4275_v40  ;;  %v4707_v16 = vor.u32 %v5140_v10, %v4706_v8  ;;  %v4538_v40 = vld [vmem:[%s6905_s10 + $0x210] sm:$0xf]  ;;  %v5077_v10 = vld [vmem:[%s6905_s10 + $0x174] sm:$0xf]  ;;  %v5166_v62 = vld [vmem:[%s6905_s10 + $0x434] sm:$0xf0] }
 0x566   :  { %3218 = vmatpush.bf16.msra.mxu2 %v4443_v61  ;;  %v5150_v61 = vld [vmem:[%s6905_s10 + $0x3b4] sm:$0xf0]  ;;  %v4539_v46 = vor.u32 %v5098_v41, %v4538_v40  ;;  %v5041_v41 = vld [vmem:[%s6905_s10 + $0x54] sm:$0xf]  ;;  %v4810_v0 = vld [vmem:[%s6905_s10 + $0x430] sm:$0xf] }
 0x567   :  { %v4747_v43 = vor.u32 %v5150_v61, %v4746_v60  ;;  %v5096_v60 = vld [vmem:[%s6905_s10 + $0x204] sm:$0xf0] }
 0x568   :  { %3209 = vmatpush.bf16.msrb.mxu0 %v4347_v29  ;;  %v4555_v29 = vor.u32 %v5102_v19, %v4554_v18  ;;  %v5172_v18 = vld [vmem:[%s6905_s10 + $0x464] sm:$0xf0]  ;;  %v4335_v19 = vor.u32 %v5045_v6, %v4332_v36  ;;  %v4811_v36 = vor.u32 %v5166_v62, %v4810_v0  ;;  %v5125_v0 = vld [vmem:[%s6905_s10 + $0x2f4] sm:$0xf] }
 0x569   :  { %3242 = vmatpush.bf16.msrb.mxu3 %v4587_v47  ;;  %3285 = vmatpush.bf16.msra.mxu1 %v4747_v43  ;;  %v4683_v47 = vor.u32 %v5134_v44, %v4682_v42  ;;  %v4835_v30 = vor.u32 %v5172_v18, %v4834_v59  ;;  %v4316_v42 = vld [vmem:[%s6905_s10 + $0x58] sm:$0xf0]  ;;  %v5057_v44 = vld [vmem:[%s6905_s10 + $0xd4] sm:$0xf] }
 0x56a   :  { %3219 = vmatpush.bf16.msra.mxu2 %v4435_v28  ;;  %v5104_v28 = vld [vmem:[%s6905_s10 + $0x244] sm:$0xf0] }
 0x56b   :  { %v4563_v15 = vor.u32 %v5104_v28, %v4562_v39  ;;  %v4396_v39 = vld [vmem:[%s6905_s10 + $0xf8] sm:$0xf0] }
 0x56c   :  { %3210 = vmatpush.bf16.msrb.mxu0 %v4339_v53  ;;  %v4602_v53 = vld [vmem:[%s6905_s10 + $0x290] sm:$0xf] }
 0x56d   :  { %4271 = vmatmul.msk.bf16.gmra.mxu2 %vm2266_vm11, %v2265_v34  ;;  %3243 = vmatpush.bf16.msrb.mxu3 %v4579_v17  ;;  %v5116_v34 = vld [vmem:[%s6905_s10 + $0x2a4] sm:$0xf0]  ;;  %v4530_v17 = vld [vmem:[%s6905_s10 + $0x200] sm:$0xf] }
 0x56e   :  { %3220 = vmatpush.bf16.msra.mxu2 %v4427_v25  ;;  %v5118_v25 = vld [vmem:[%s6905_s10 + $0x2b4] sm:$0xf0]  ;;  %3286 = vmatpush.bf16.msra.mxu1 %v4739_v14  ;;  %v4531_v61 = vor.u32 %v5096_v60, %v4530_v17  ;;  %v5071_v17 = vld [vmem:[%s6905_s10 + $0x144] sm:$0xf]  ;;  %v4436_v60 = vld [vmem:[%s6905_s10 + $0x148] sm:$0xf0] }
 0x56f   :  { %v4619_v12 = vor.u32 %v5118_v25, %v4618_v11  ;;  %v4439_v54 = vor.u32 %v5071_v17, %v4436_v60  ;;  %v5109_v60 = vld [vmem:[%s6905_s10 + $0x274] sm:$0xf] }
 0x570   :  { %3255 = vmatpush.bf16.msra.mxu0 %v4651_v51  ;;  %v4603_v51 = vor.u32 %v5114_v27, %v4602_v53  ;;  %v5168_v53 = vld [vmem:[%s6905_s10 + $0x444] sm:$0xf0]  ;;  %v4319_v27 = vor.u32 %v5041_v41, %v4316_v42  ;;  %v4348_v41 = vld [vmem:[%s6905_s10 + $0x98] sm:$0xf0] }
 0x571   :  { %3244 = vmatpush.bf16.msrb.mxu3 %v4571_v49  ;;  %v5174_v49 = vld [vmem:[%s6905_s10 + $0x474] sm:$0xf0] }
 0x572   :  { %3221 = vmatpush.bf16.msra.mxu2 %v4419_v45  ;;  %v4611_v45 = vor.u32 %v5116_v34, %v4610_v9  ;;  %3287 = vmatpush.bf16.msra.mxu1 %v4731_v58  ;;  %v4826_v9 = vld [vmem:[%s6905_s10 + $0x450] sm:$0xf]  ;;  %v5170_v34 = vld [vmem:[%s6905_s10 + $0x454] sm:$0xf0]  ;;  %v4372_v58 = vld [vmem:[%s6905_s10 + $0xc8] sm:$0xf0] }
 0x573   :  { %v4375_v1 = vor.u32 %v5055_v56, %v4372_v58  ;;  %v4340_v56 = vld [vmem:[%s6905_s10 + $0x88] sm:$0xf0] }
 0x574   :  { %3256 = vmatpush.bf16.msra.mxu0 %v4643_v2  ;;  %v4722_v2 = vld [vmem:[%s6905_s10 + $0x380] sm:$0xf]  ;;  %v4404_v58 = vld [vmem:[%s6905_s10 + $0x108] sm:$0xf0] }
 0x575   :  { %3245 = vmatpush.bf16.msrb.mxu3 %v4563_v15  ;;  %v4723_v43 = vor.u32 %v5144_v4, %v4722_v2  ;;  %v5037_v2 = vld [vmem:[%s6905_s10 + $0x34] sm:$0xf] }
 0x576   :  { %3222 = vmatpush.bf16.msra.mxu2 %v4411_v57  ;;  %v4667_v57 = vor.u32 %v5130_v55, %v4666_v37  ;;  %v5039_v55 = vld [vmem:[%s6905_s10 + $0x44] sm:$0xf] }
 0x577   :  { %3288 = vmatpush.bf16.msra.mxu1 %v4723_v43 }
 0x578   :  { %3257 = vmatpush.bf16.msra.mxu0 %v4635_v7  ;;  %v4460_v7 = vld [vmem:[%s6905_s10 + $0x178] sm:$0xf0] }
 0x579   :  { %3246 = vmatpush.bf16.msrb.mxu3 %v4555_v29  ;;  %v4463_v25 = vor.u32 %v5077_v10, %v4460_v7  ;;  %v5043_v29 = vld [vmem:[%s6905_s10 + $0x64] sm:$0xf]  ;;  %v5164_v10 = vld [vmem:[%s6905_s10 + $0x424] sm:$0xf0] }
 0x57a   :  { %3223 = vmatpush.bf16.msra.mxu2 %v4403_v5  ;;  %v4842_v5 = vld [vmem:[%s6905_s10 + $0x470] sm:$0xf] }
 0x57b   :  { %v4843_v8 = vor.u32 %v5174_v49, %v4842_v5  ;;  %v5053_v5 = vld [vmem:[%s6905_s10 + $0xb4] sm:$0xf]  ;;  %v4364_v49 = vld [vmem:[%s6905_s10 + $0xb8] sm:$0xf0] }
 0x57c   :  { %3258 = vmatpush.bf16.msra.mxu0 %v4627_v22 }
 0x57d   :  { %3247 = vmatpush.bf16.msrb.mxu3 %v4547_v38 }
 0x57e   :  { %3268 = vmatpush.bf16.msrb.mxu2 %v4715_v35  ;;  %v5061_v35 = vld [vmem:[%s6905_s10 + $0xf4] sm:$0xf] }
 0x57f   :  { %v4399_v20 = vor.u32 %v5061_v35, %v4396_v39  ;;  %v5069_v35 = vld [vmem:[%s6905_s10 + $0x134] sm:$0xf]  ;;  %v4428_v39 = vld [vmem:[%s6905_s10 + $0x138] sm:$0xf0] }
 0x580   :  { %3259 = vmatpush.bf16.msra.mxu0 %v4619_v12  ;;  %v4452_v12 = vld [vmem:[%s6905_s10 + $0x168] sm:$0xf0] }
 0x581   :  { %3248 = vmatpush.bf16.msrb.mxu3 %v4539_v46  ;;  %v4455_v40 = vor.u32 %v5075_v26, %v4452_v12  ;;  %v4827_v46 = vor.u32 %v5170_v34, %v4826_v9  ;;  %v5162_v26 = vld [vmem:[%s6905_s10 + $0x414] sm:$0xf0]  ;;  %v5033_v34 = vld [vmem:[%s6905_s10 + $0x14] sm:$0xf] }
 0x582   :  { %3269 = vmatpush.bf16.msrb.mxu2 %v4707_v16 }
 0x584   :  { %3260 = vmatpush.bf16.msra.mxu0 %v4611_v45 }
 0x585   :  { %3249 = vmatpush.bf16.msrb.mxu3 %v4531_v61  ;;  %v4311_v61 = vor.u32 %v5039_v55, %v4308_v23  ;;  %v5047_v55 = vld [vmem:[%s6905_s10 + $0x84] sm:$0xf] }
 0x586   :  { %3270 = vmatpush.bf16.msrb.mxu2 %v4699_v31  ;;  %v4324_v31 = vld [vmem:[%s6905_s10 + $0x68] sm:$0xf0] }
 0x587   :  { %v4327_v38 = vor.u32 %v5043_v29, %v4324_v31  ;;  %v4356_v29 = vld [vmem:[%s6905_s10 + $0xa8] sm:$0xf0] }
 0x588   :  { %3261 = vmatpush.bf16.msra.mxu0 %v4603_v51  ;;  %v4447_v51 = vor.u32 %v5073_v48, %v4444_v50  ;;  %v5160_v48 = vld [vmem:[%s6905_s10 + $0x404] sm:$0xf0]  ;;  %v5093_v50 = vld [vmem:[%s6905_s10 + $0x1f4] sm:$0xf] }
 0x58a   :  { %3271 = vmatpush.bf16.msrb.mxu2 %v4691_v24  ;;  %v4391_v24 = vor.u32 %v5059_v32, %v4388_v33  ;;  %v5067_v32 = vld [vmem:[%s6905_s10 + $0x124] sm:$0xf]  ;;  %v4794_v33 = vld [vmem:[%s6905_s10 + $0x410] sm:$0xf] }
 0x58c   :  { %3262 = vmatpush.bf16.msra.mxu0 %v4595_v63 }
 0x58e   :  { %3272 = vmatpush.bf16.msrb.mxu2 %v4683_v47  ;;  %v4380_v47 = vld [vmem:[%s6905_s10 + $0xd8] sm:$0xf0] }
 0x58f   :  { %v4383_v37 = vor.u32 %v5057_v44, %v4380_v47  ;;  %v4795_v44 = vor.u32 %v5162_v26, %v4794_v33  ;;  %v4786_v47 = vld [vmem:[%s6905_s10 + $0x400] sm:$0xf]  ;;  %v4572_v33 = vld [vmem:[%s6905_s10 + $0x258] sm:$0xf0]  ;;  %v5121_v26 = vld [vmem:[%s6905_s10 + $0x2d4] sm:$0xf] }
 0x590   :  { %v4787_v17 = vor.u32 %v5160_v48, %v4786_v47  ;;  %v4692_v47 = vld [vmem:[%s6905_s10 + $0x348] sm:$0xf0] }
 0x592   :  { %3273 = vmatpush.bf16.msrb.mxu2 %v4675_v52  ;;  %v4818_v52 = vld [vmem:[%s6905_s10 + $0x440] sm:$0xf] }
 0x596   :  { %3274 = vmatpush.bf16.msrb.mxu2 %v4667_v57  ;;  %v4819_v57 = vor.u32 %v5168_v53, %v4818_v52  ;;  %v4524_v52 = vld [vmem:[%s6905_s10 + $0x1f8] sm:$0xf0] }
 0x597   :  { %v4527_v62 = vor.u32 %v5093_v50, %v4524_v52  ;;  %v5085_v52 = vld [vmem:[%s6905_s10 + $0x1b4] sm:$0xf] }
 0x59a   :  { %3275 = vmatpush.bf16.msrb.mxu2 %v4659_v3  ;;  %v4300_v3 = vld [vmem:[%s6905_s10 + $0x38] sm:$0xf0] }
 0x59b   :  { %v4303_v59 = vor.u32 %v5037_v2, %v4300_v3  ;;  %v4343_v3 = vor.u32 %v5047_v55, %v4340_v56  ;;  %v4556_v55 = vld [vmem:[%s6905_s10 + $0x238] sm:$0xf0] }
 0x59c   :  { %v4620_v56 = vld [vmem:[%s6905_s10 + $0x2b8] sm:$0xf0] }
 0x5e0   :  { %v2286_v28 = vpop.f32.mrf.mxu2 }
 0x5e1   :  { %v2296_v13 = vrot.slane %v2286_v28, 2  ;;  %v2298_v14 = vrot.slane %v2286_v28, 4  ;;  %v2300_v15 = vrot.slane %v2286_v28, 6  ;;  %v6368_v16 = vpack.c.bf16 %v2286_v28, %v2286_v28 }
 0x5e3   :  { %v6373_v21 = vpack.c.bf16 %v2296_v13, %v2296_v13  ;;  %v6375_v22 = vpack.c.bf16 %v2298_v14, %v2298_v14  ;;  %v6377_v11 = vpack.c.bf16 %v2300_v15, %v2300_v15  ;;  %3198 = vmatmul.bf16.vlgmr.msra.gmra.mxu3 %v6368_v16  ;;  %v4367_v13 = vor.u32 %v5053_v5, %v4364_v49  ;;  %v5035_v14 = vld [vmem:[%s6905_s10 + $0x24] sm:$0xf]  ;;  %v4516_v49 = vld [vmem:[%s6905_s10 + $0x1e8] sm:$0xf0] }
 0x5e4   :  { %3294 = vmatpush.bf16.msra.mxu3 %v4843_v8  ;;  %v4802_v8 = vld [vmem:[%s6905_s10 + $0x420] sm:$0xf]  ;;  %v5091_v5 = vld [vmem:[%s6905_s10 + $0x1e4] sm:$0xf] }
 0x5e5   :  { %3211 = vmatmul.bf16.vlgmr.msrb.gmra.mxu0 %v6373_v21  ;;  %3224 = vmatmul.bf16.vlgmr.msra.gmra.mxu2 %v6375_v22  ;;  %v4803_v31 = vor.u32 %v5164_v10, %v4802_v8  ;;  %v4580_v8 = vld [vmem:[%s6905_s10 + $0x268] sm:$0xf0]  ;;  %v5123_v10 = vld [vmem:[%s6905_s10 + $0x2e4] sm:$0xf] }
 0x5e6   :  { %3237 = vmatmul.bf16.vlgmr.msrb.gmra.mxu1 %v6377_v11  ;;  %3307 = vmatpush.bf16.msrb.mxu0 %v4335_v19  ;;  %v4431_v19 = vor.u32 %v5069_v35, %v4428_v39  ;;  %v5107_v39 = vld [vmem:[%s6905_s10 + $0x264] sm:$0xf] }
 0x5e7   :  { %3320 = vmatpush.bf16.msra.mxu2 %v4399_v20  ;;  %3333 = vmatpush.bf16.msrb.mxu1 %v4463_v25  ;;  %v4292_v20 = vld [vmem:[%s6905_s10 + $0x28] sm:$0xf0]  ;;  %v5051_v25 = vld [vmem:[%s6905_s10 + $0xa4] sm:$0xf] }
 0x5e8   :  { %3295 = vmatpush.bf16.msra.mxu3 %v4835_v30  ;;  %v2288_v45 = vpop.f32.mrf.mxu2  ;;  %v4420_v30 = vld [vmem:[%s6905_s10 + $0x128] sm:$0xf0]  ;;  %v4295_v12 = vor.u32 %v5035_v14, %v4292_v20  ;;  %v4359_v9 = vor.u32 %v5051_v25, %v4356_v29  ;;  %v5139_v14 = vld [vmem:[%s6905_s10 + $0x364] sm:$0xf]  ;;  %v4519_v20 = vor.u32 %v5091_v5, %v4516_v49  ;;  %v5089_v25 = vld [vmem:[%s6905_s10 + $0x1d4] sm:$0xf] }
 0x5e9   :  { %v2303_v63 = vrot.slane %v2288_v45, 2  ;;  %v2305_v4 = vrot.slane %v2288_v45, 4  ;;  %v2307_v43 = vrot.slane %v2288_v45, 6  ;;  %v6475_v28 = vpack.c.bf16 %v2288_v45, %v2288_v45  ;;  %v5065_v45 = vld [vmem:[%s6905_s10 + $0x114] sm:$0xf] }
 0x5ea   :  { %3308 = vmatpush.bf16.msrb.mxu0 %v4327_v38  ;;  %v4423_v38 = vor.u32 %v5067_v32, %v4420_v30  ;;  %v4508_v29 = vld [vmem:[%s6905_s10 + $0x1d8] sm:$0xf0]  ;;  %v5105_v30 = vld [vmem:[%s6905_s10 + $0x254] sm:$0xf] }
 0x5eb   :  { %3321 = vmatpush.bf16.msra.mxu2 %v4391_v24  ;;  %3334 = vmatpush.bf16.msrb.mxu1 %v4455_v40  ;;  %v6483_v7 = vpack.c.bf16 %v2303_v63, %v2303_v63  ;;  %v6488_v15 = vpack.c.bf16 %v2305_v4, %v2305_v4  ;;  %v6490_v18 = vpack.c.bf16 %v2307_v43, %v2307_v43  ;;  %v4284_v24 = vld [vmem:[%s6905_s10 + $0x18] sm:$0xf0]  ;;  %v5049_v40 = vld [vmem:[%s6905_s10 + $0x94] sm:$0xf] }
 0x5ec   :  { %3296 = vmatpush.bf16.msra.mxu3 %v4827_v46  ;;  %v4412_v46 = vld [vmem:[%s6905_s10 + $0x118] sm:$0xf0]  ;;  %v4287_v53 = vor.u32 %v5033_v34, %v4284_v24  ;;  %v5087_v24 = vld [vmem:[%s6905_s10 + $0x1c4] sm:$0xf] }
 0x5ed   :  { %v4415_v23 = vor.u32 %v5065_v45, %v4412_v46  ;;  %v4652_v63 = vld [vmem:[%s6905_s10 + $0x2f8] sm:$0xf0]  ;;  %v4628_v45 = vld [vmem:[%s6905_s10 + $0x2c8] sm:$0xf0]  ;;  %v5135_v46 = vld [vmem:[%s6905_s10 + $0x344] sm:$0xf] }
 0x5ee   :  { %3309 = vmatpush.bf16.msrb.mxu0 %v4319_v27  ;;  %v4351_v27 = vor.u32 %v5049_v40, %v4348_v41  ;;  %v4700_v34 = vld [vmem:[%s6905_s10 + $0x358] sm:$0xf0]  ;;  %v4500_v40 = vld [vmem:[%s6905_s10 + $0x1c8] sm:$0xf0] }
 0x5ef   :  { %3322 = vmatpush.bf16.msra.mxu2 %v4383_v37  ;;  %3335 = vmatpush.bf16.msrb.mxu1 %v4447_v51  ;;  %v5031_v37 = vld [vmem:[%s6905_s10 + $0x4] sm:$0xf]  ;;  %v4276_v51 = vld [vmem:[%s6905_s10 + $0x8] sm:$0xf0]  ;;  %v4503_v48 = vor.u32 %v5087_v24, %v4500_v40 }
 0x5f0   :  { %3297 = vmatpush.bf16.msra.mxu3 %v4819_v57  ;;  %v6467_v6 = vpop.f32.mrf.mxu2  ;;  %v5063_v57 = vld [vmem:[%s6905_s10 + $0x104] sm:$0xf]  ;;  %v4279_v2 = vor.u32 %v5031_v37, %v4276_v51  ;;  %v4695_v37 = vor.u32 %v5135_v46, %v4692_v47  ;;  %v5101_v51 = vld [vmem:[%s6905_s10 + $0x234] sm:$0xf]  ;;  %v4660_v40 = vld [vmem:[%s6905_s10 + $0x308] sm:$0xf0] }
 0x5f1   :  { %v4407_v4 = vor.u32 %v5063_v57, %v4404_v58  ;;  %v5133_v57 = vld [vmem:[%s6905_s10 + $0x334] sm:$0xf]  ;;  %v4684_v58 = vld [vmem:[%s6905_s10 + $0x338] sm:$0xf0]  ;;  %v5127_v24 = vld [vmem:[%s6905_s10 + $0x304] sm:$0xf] }
 0x5f2   :  { %3310 = vmatpush.bf16.msrb.mxu0 %v4311_v61  ;;  %v4588_v61 = vld [vmem:[%s6905_s10 + $0x278] sm:$0xf0]  ;;  %v4663_v46 = vor.u32 %v5127_v24, %v4660_v40 }
 0x5f3   :  { %3323 = vmatpush.bf16.msra.mxu2 %v4375_v1  ;;  %3336 = vmatpush.bf16.msrb.mxu1 %v4439_v54  ;;  %v5141_v1 = vld [vmem:[%s6905_s10 + $0x374] sm:$0xf]  ;;  %v4716_v54 = vld [vmem:[%s6905_s10 + $0x378] sm:$0xf0]  ;;  %v4591_v43 = vor.u32 %v5109_v60, %v4588_v61  ;;  %v4559_v60 = vor.u32 %v5101_v51, %v4556_v55  ;;  %v5083_v61 = vld [vmem:[%s6905_s10 + $0x1a4] sm:$0xf] }
 0x5f4   :  { %3250 = vmatmul.bf16.vlgmr.msrb.gmra.mxu3 %v6475_v28  ;;  %v4719_v35 = vor.u32 %v5141_v1, %v4716_v54  ;;  %v5099_v1 = vld [vmem:[%s6905_s10 + $0x224] sm:$0xf]  ;;  %v4548_v54 = vld [vmem:[%s6905_s10 + $0x228] sm:$0xf0]  ;;  %v5153_v51 = vld [vmem:[%s6905_s10 + $0x3d4] sm:$0xf] }
 0x5f5   :  { %3298 = vmatpush.bf16.msra.mxu3 %v4811_v36  ;;  %3263 = vmatmul.bf16.vlgmr.msra.gmra.mxu0 %v6483_v7  ;;  %v4655_v36 = vor.u32 %v5125_v0, %v4652_v63  ;;  %v4484_v0 = vld [vmem:[%s6905_s10 + $0x1a8] sm:$0xf0]  ;;  %v4687_v63 = vor.u32 %v5133_v57, %v4684_v58  ;;  %v4551_v49 = vor.u32 %v5099_v1, %v4548_v54  ;;  %v4764_v55 = vld [vmem:[%s6905_s10 + $0x3d8] sm:$0xf0] }
 0x5f6   :  { %3276 = vmatmul.bf16.vlgmr.msrb.gmra.mxu2 %v6488_v15  ;;  %3289 = vmatmul.bf16.vlgmr.msra.gmra.mxu1 %v6490_v18  ;;  %v4487_v5 = vor.u32 %v5083_v61, %v4484_v0  ;;  %v4756_v58 = vld [vmem:[%s6905_s10 + $0x3c8] sm:$0xf0]  ;;  %v5149_v61 = vld [vmem:[%s6905_s10 + $0x3b4] sm:$0xf]  ;;  %v4748_v0 = vld [vmem:[%s6905_s10 + $0x3b8] sm:$0xf0] }
 0x5f7   :  { %3311 = vmatpush.bf16.msrb.mxu0 %v4303_v59  ;;  %3324 = vmatpush.bf16.msra.mxu2 %v4367_v13  ;;  %v6600_v59 = vpack.c.bf16 %v6467_v6, %v6467_v6  ;;  %v4644_v13 = vld [vmem:[%s6905_s10 + $0x2e8] sm:$0xf0]  ;;  %v4583_v6 = vor.u32 %v5107_v39, %v4580_v8  ;;  %v4751_v1 = vor.u32 %v5149_v61, %v4748_v0 }
 0x5f8   :  { %3337 = vmatpush.bf16.msrb.mxu1 %v4431_v19  ;;  %v2293_v42 = vpop.f32.mrf.mxu2  ;;  %v4708_v19 = vld [vmem:[%s6905_s10 + $0x368] sm:$0xf0] }
 0x5f9   :  { %3299 = vmatpush.bf16.msra.mxu3 %v4803_v31  ;;  %v4647_v31 = vor.u32 %v5123_v10, %v4644_v13  ;;  %v4711_v32 = vor.u32 %v5139_v14, %v4708_v19  ;;  %v5097_v10 = vld [vmem:[%s6905_s10 + $0x214] sm:$0xf]  ;;  %v4540_v13 = vld [vmem:[%s6905_s10 + $0x218] sm:$0xf0] }
 0x5fa   :  { %v5113_v14 = vld [vmem:[%s6905_s10 + $0x294] sm:$0xf]  ;;  %v4604_v19 = vld [vmem:[%s6905_s10 + $0x298] sm:$0xf0] }
 0x5fb   :  { %3312 = vmatpush.bf16.msrb.mxu0 %v4295_v12  ;;  %3325 = vmatpush.bf16.msra.mxu2 %v4359_v9  ;;  %v4636_v12 = vld [vmem:[%s6905_s10 + $0x2d8] sm:$0xf0]  ;;  %v5137_v9 = vld [vmem:[%s6905_s10 + $0x354] sm:$0xf] }
 0x5fc   :  { %3338 = vmatpush.bf16.msrb.mxu1 %v4423_v38  ;;  %v4511_v38 = vor.u32 %v5089_v25, %v4508_v29  ;;  %v4639_v41 = vor.u32 %v5121_v26, %v4636_v12  ;;  %v4703_v42 = vor.u32 %v5137_v9, %v4700_v34  ;;  %v5079_v29 = vld [vmem:[%s6905_s10 + $0x184] sm:$0xf]  ;;  %v4607_v26 = vor.u32 %v5113_v14, %v4604_v19  ;;  %v4532_v34 = vld [vmem:[%s6905_s10 + $0x208] sm:$0xf0] }
 0x5fd   :  { %3300 = vmatpush.bf16.msra.mxu3 %v4795_v44  ;;  %v5119_v44 = vld [vmem:[%s6905_s10 + $0x2c4] sm:$0xf]  ;;  %v4724_v19 = vld [vmem:[%s6905_s10 + $0x388] sm:$0xf0] }
 0x5fe   :  { %v5095_v9 = vld [vmem:[%s6905_s10 + $0x204] sm:$0xf] }
 0x5ff   :  { %3313 = vmatpush.bf16.msrb.mxu0 %v4287_v53  ;;  %3326 = vmatpush.bf16.msra.mxu2 %v4351_v27  ;;  %v4492_v53 = vld [vmem:[%s6905_s10 + $0x1b8] sm:$0xf0]  ;;  %v4631_v27 = vor.u32 %v5119_v44, %v4628_v45  ;;  %v4535_v44 = vor.u32 %v5095_v9, %v4532_v34  ;;  %v5143_v14 = vld [vmem:[%s6905_s10 + $0x384] sm:$0xf] }
 0x600   :  { %3339 = vmatpush.bf16.msrb.mxu1 %v4415_v23  ;;  %v5117_v23 = vld [vmem:[%s6905_s10 + $0x2b4] sm:$0xf] }
 0x601   :  { %3301 = vmatpush.bf16.msra.mxu3 %v4787_v17  ;;  %v4495_v17 = vor.u32 %v5085_v52, %v4492_v53  ;;  %v5171_v52 = vld [vmem:[%s6905_s10 + $0x464] sm:$0xf]  ;;  %v4836_v53 = vld [vmem:[%s6905_s10 + $0x468] sm:$0xf0] }
 0x603   :  { %3314 = vmatpush.bf16.msrb.mxu0 %v4279_v2  ;;  %3327 = vmatpush.bf16.msra.mxu2 %v4343_v3  ;;  %v5115_v2 = vld [vmem:[%s6905_s10 + $0x2a4] sm:$0xf]  ;;  %v4612_v3 = vld [vmem:[%s6905_s10 + $0x2a8] sm:$0xf0] }
 0x604   :  { %3340 = vmatpush.bf16.msrb.mxu1 %v4407_v4  ;;  %3302 = vmatmul.bf16.vlgmr.msra.gmra.mxu3 %v6600_v59  ;;  %v5131_v4 = vld [vmem:[%s6905_s10 + $0x324] sm:$0xf]  ;;  %v4615_v39 = vor.u32 %v5115_v2, %v4612_v3  ;;  %v4740_v3 = vld [vmem:[%s6905_s10 + $0x3a8] sm:$0xf0] }
 0x605   :  { %3346 = vmatpush.bf16.msrb.mxu3 %v4527_v62  ;;  %v4623_v62 = vor.u32 %v5117_v23, %v4620_v56  ;;  %v5169_v23 = vld [vmem:[%s6905_s10 + $0x454] sm:$0xf]  ;;  %v4767_v56 = vor.u32 %v5153_v51, %v4764_v55  ;;  %v5147_v2 = vld [vmem:[%s6905_s10 + $0x3a4] sm:$0xf] }
 0x606   :  { %3315 = vmatmul.bf16.vlgmr.msrb.gmra.mxu0 %v6368_v16  ;;  %3328 = vmatmul.bf16.vlgmr.msra.gmra.mxu2 %v6373_v21  ;;  %v4575_v16 = vor.u32 %v5105_v30, %v4572_v33  ;;  %v5103_v21 = vld [vmem:[%s6905_s10 + $0x244] sm:$0xf]  ;;  %v5157_v30 = vld [vmem:[%s6905_s10 + $0x3f4] sm:$0xf]  ;;  %v4780_v33 = vld [vmem:[%s6905_s10 + $0x3f8] sm:$0xf0] }
 0x607   :  { %3359 = vmatpush.bf16.msra.mxu0 %v4591_v43  ;;  %3372 = vmatpush.bf16.msrb.mxu2 %v4655_v36  ;;  %v4676_v43 = vld [vmem:[%s6905_s10 + $0x328] sm:$0xf0]  ;;  %v5081_v36 = vld [vmem:[%s6905_s10 + $0x194] sm:$0xf] }
 0x608   :  { %3385 = vmatpush.bf16.msra.mxu1 %v4719_v35  ;;  %v4476_v35 = vld [vmem:[%s6905_s10 + $0x198] sm:$0xf0]  ;;  %v4679_v8 = vor.u32 %v5131_v4, %v4676_v43  ;;  %v5163_v4 = vld [vmem:[%s6905_s10 + $0x424] sm:$0xf]  ;;  %v4804_v43 = vld [vmem:[%s6905_s10 + $0x428] sm:$0xf0] }
 0x609   :  { %3347 = vmatpush.bf16.msrb.mxu3 %v4519_v20  ;;  %3341 = vmatmul.bf16.vlgmr.msrb.gmra.mxu1 %v6375_v22  ;;  %v4564_v22 = vld [vmem:[%s6905_s10 + $0x248] sm:$0xf0]  ;;  %v5129_v20 = vld [vmem:[%s6905_s10 + $0x314] sm:$0xf]  ;;  %v4479_v25 = vor.u32 %v5081_v36, %v4476_v35  ;;  %v4732_v35 = vld [vmem:[%s6905_s10 + $0x398] sm:$0xf0] }
 0x60a   :  { %v4567_v50 = vor.u32 %v5103_v21, %v4564_v22  ;;  %v4844_v21 = vld [vmem:[%s6905_s10 + $0x478] sm:$0xf0]  ;;  %v4783_v22 = vor.u32 %v5157_v30, %v4780_v33  ;;  %v5145_v36 = vld [vmem:[%s6905_s10 + $0x394] sm:$0xf] }
 0x60b   :  { %3360 = vmatpush.bf16.msra.mxu0 %v4583_v6  ;;  %3373 = vmatpush.bf16.msrb.mxu2 %v4647_v31  ;;  %v4668_v6 = vld [vmem:[%s6905_s10 + $0x318] sm:$0xf0]  ;;  %v4543_v31 = vor.u32 %v5097_v10, %v4540_v13  ;;  %v4735_v10 = vor.u32 %v5145_v36, %v4732_v35 }
 0x60c   :  { %3386 = vmatpush.bf16.msra.mxu1 %v4711_v32  ;;  %v4468_v32 = vld [vmem:[%s6905_s10 + $0x188] sm:$0xf0]  ;;  %v4671_v12 = vor.u32 %v5129_v20, %v4668_v6  ;;  %v5159_v20 = vld [vmem:[%s6905_s10 + $0x404] sm:$0xf] }
 0x60d   :  { %3348 = vmatpush.bf16.msrb.mxu3 %v4511_v38  ;;  %v5111_v38 = vld [vmem:[%s6905_s10 + $0x284] sm:$0xf]  ;;  %v4788_v6 = vld [vmem:[%s6905_s10 + $0x408] sm:$0xf0] }
 0x60f   :  { %3361 = vmatpush.bf16.msra.mxu0 %v4575_v16  ;;  %3374 = vmatpush.bf16.msrb.mxu2 %v4639_v41  ;;  %v4596_v16 = vld [vmem:[%s6905_s10 + $0x288] sm:$0xf0]  ;;  %v4471_v41 = vor.u32 %v5079_v29, %v4468_v32  ;;  %v4791_v29 = vor.u32 %v5159_v20, %v4788_v6 }
 0x610   :  { %3387 = vmatpush.bf16.msra.mxu1 %v4703_v42  ;;  %v5173_v42 = vld [vmem:[%s6905_s10 + $0x474] sm:$0xf]  ;;  %v4599_v45 = vor.u32 %v5111_v38, %v4596_v16 }
 0x611   :  { %3349 = vmatpush.bf16.msrb.mxu3 %v4503_v48  ;;  %v4847_v47 = vor.u32 %v5173_v42, %v4844_v21  ;;  %v5155_v48 = vld [vmem:[%s6905_s10 + $0x3e4] sm:$0xf] }
 0x613   :  { %3362 = vmatpush.bf16.msra.mxu0 %v4567_v50  ;;  %3375 = vmatpush.bf16.msrb.mxu2 %v4631_v27  ;;  %v4772_v50 = vld [vmem:[%s6905_s10 + $0x3e8] sm:$0xf0] }
 0x614   :  { %3388 = vmatpush.bf16.msra.mxu1 %v4695_v37  ;;  %v4775_v27 = vor.u32 %v5155_v48, %v4772_v50  ;;  %v4839_v37 = vor.u32 %v5171_v52, %v4836_v53 }
 0x615   :  { %3350 = vmatpush.bf16.msrb.mxu3 %v4495_v17  ;;  %v5167_v17 = vld [vmem:[%s6905_s10 + $0x444] sm:$0xf] }
 0x617   :  { %3363 = vmatpush.bf16.msra.mxu0 %v4559_v60  ;;  %3376 = vmatpush.bf16.msrb.mxu2 %v4623_v62  ;;  %v5165_v62 = vld [vmem:[%s6905_s10 + $0x434] sm:$0xf] }
 0x618   :  { %3389 = vmatpush.bf16.msra.mxu1 %v4687_v63  ;;  %v4812_v63 = vld [vmem:[%s6905_s10 + $0x438] sm:$0xf0] }
 0x619   :  { %3351 = vmatpush.bf16.msrb.mxu3 %v4487_v5  ;;  %v4815_v54 = vor.u32 %v5165_v62, %v4812_v63  ;;  %v4743_v5 = vor.u32 %v5147_v2, %v4740_v3 }
 0x61b   :  { %3364 = vmatpush.bf16.msra.mxu0 %v4551_v49  ;;  %3377 = vmatpush.bf16.msrb.mxu2 %v4615_v39  ;;  %v4807_v49 = vor.u32 %v5163_v4, %v4804_v43  ;;  %v5161_v39 = vld [vmem:[%s6905_s10 + $0x414] sm:$0xf] }
 0x61c   :  { %3390 = vmatpush.bf16.msra.mxu1 %v4679_v8  ;;  %v4796_v8 = vld [vmem:[%s6905_s10 + $0x418] sm:$0xf0] }
 0x61d   :  { %3352 = vmatpush.bf16.msrb.mxu3 %v4479_v25  ;;  %v4799_v13 = vor.u32 %v5161_v39, %v4796_v8  ;;  %v4727_v25 = vor.u32 %v5143_v14, %v4724_v19 }
 0x61f   :  { %3365 = vmatpush.bf16.msra.mxu0 %v4543_v31  ;;  %3378 = vmatpush.bf16.msrb.mxu2 %v4607_v26  ;;  %v6864_v31 = vld [vmem:[%s6908_s11] sm:$0x77] }
 0x620   :  { %3391 = vmatpush.bf16.msra.mxu1 %v4671_v12  ;;  %v2464_v32 = vperm.slane %v6864_v31, 0  ;;  %v2465_v61 = vperm.slane %v6864_v31, 4 }
 0x621   :  { %3353 = vmatpush.bf16.msrb.mxu3 %v4471_v41 }
 0x622   :  { %v2468_v26 = vperm.slane %v2464_v32, 0  ;;  %v2469_v2 = vperm.slane %v2465_v61, 0 }
 0x623   :  { %3366 = vmatpush.bf16.msra.mxu0 %v4535_v44  ;;  %3379 = vmatpush.bf16.msrb.mxu2 %v4599_v45 }
 0x624   :  { %3392 = vmatpush.bf16.msra.mxu1 %v4663_v46  ;;  %3354 = vmatmul.bf16.vlgmr.msrb.gmra.mxu3 %v6377_v11  ;;  %v4828_v11 = vld [vmem:[%s6905_s10 + $0x458] sm:$0xf0] }
 0x625   :  { %3398 = vmatpush.bf16.msra.mxu3 %v4783_v22  ;;  %v4831_v57 = vor.u32 %v5169_v23, %v4828_v11 }
 0x626   :  { %3367 = vmatmul.bf16.vlgmr.msra.gmra.mxu0 %v6475_v28  ;;  %3380 = vmatmul.bf16.vlgmr.msrb.gmra.mxu2 %v6483_v7  ;;  %v5151_v28 = vld [vmem:[%s6905_s10 + $0x3c4] sm:$0xf]  ;;  %v4820_v7 = vld [vmem:[%s6905_s10 + $0x448] sm:$0xf0] }
 0x627   :  { %3411 = vmatpush.bf16.msrb.mxu0 %v4847_v47  ;;  %3393 = vmatmul.bf16.vlgmr.msra.gmra.mxu1 %v6488_v15  ;;  %v4759_v15 = vor.u32 %v5151_v28, %v4756_v58  ;;  %v4823_v60 = vor.u32 %v5167_v17, %v4820_v7 }
 0x629   :  { %3399 = vmatpush.bf16.msra.mxu3 %v4775_v27 }
 0x62b   :  { %3412 = vmatpush.bf16.msrb.mxu0 %v4839_v37 }
 0x62d   :  { %3400 = vmatpush.bf16.msra.mxu3 %v4767_v56 }
 0x62f   :  { %3413 = vmatpush.bf16.msrb.mxu0 %v4831_v57 }
 0x631   :  { %3401 = vmatpush.bf16.msra.mxu3 %v4759_v15 }
 0x633   :  { %3414 = vmatpush.bf16.msrb.mxu0 %v4823_v60 }
 0x635   :  { %3402 = vmatpush.bf16.msra.mxu3 %v4751_v1 }
 0x637   :  { %3415 = vmatpush.bf16.msrb.mxu0 %v4815_v54 }
 0x639   :  { %3403 = vmatpush.bf16.msra.mxu3 %v4743_v5 }
 0x63b   :  { %3416 = vmatpush.bf16.msrb.mxu0 %v4807_v49 }
 0x63d   :  { %3404 = vmatpush.bf16.msra.mxu3 %v4735_v10 }
 0x63f   :  { %3417 = vmatpush.bf16.msrb.mxu0 %v4799_v13 }
 0x641   :  { %3405 = vmatpush.bf16.msra.mxu3 %v4727_v25 }
 0x643   :  { %3418 = vmatpush.bf16.msrb.mxu0 %v4791_v29 }
 0x644   :  { %3406 = vmatmul.bf16.vlgmr.msra.gmra.mxu3 %v6490_v18 }
 0x646   :  { %3419 = vmatmul.bf16.vlgmr.msrb.gmra.mxu0 %v6600_v59 }
 0x662   :  { %v3212_v30 = vpop.f32.mrf.mxu0 }
 0x663   :  { %v3238_v33 = vpop.f32.mrf.mxu1 }
 0x666   :  { %v3199_v12 = vpop.f32.mrf.mxu3 }
 0x667   :  { %v3200_v9 = vadd.f32 %v3199_v12, %v2468_v26 }
 0x668   :  { %v3225_v34 = vpop.f32.mrf.mxu2 }
 0x669   :  { %v3213_v38 = vadd.f32 %v3212_v30, %v3200_v9 }
 0x66a   :  { %v3214_v16 = vpop.f32.mrf.mxu0 }
 0x66b   :  { %v3226_v24 = vadd.f32 %v3225_v34, %v3213_v38  ;;  %v3240_v40 = vpop.f32.mrf.mxu1 }
 0x66d   :  { %v3239_v18 = vadd.f32 %v3238_v33, %v3226_v24 }
 0x66e   :  { %v3201_v41 = vpop.f32.mrf.mxu3 }
 0x670   :  { %v3227_v59 = vpop.f32.mrf.mxu2 }
 0x672   :  { %v3264_v42 = vpop.f32.mrf.mxu0 }
 0x673   :  { %v3290_v21 = vpop.f32.mrf.mxu1 }
 0x677   :  { %v3251_v22 = vpop.f32.mrf.mxu3 }
 0x678   :  { %v3252_v44 = vadd.f32 %v3251_v22, %v3239_v18 }
 0x679   :  { %v3277_v45 = vpop.f32.mrf.mxu2 }
 0x67a   :  { %v3265_v46 = vadd.f32 %v3264_v42, %v3252_v44  ;;  %v3266_v47 = vpop.f32.mrf.mxu0 }
 0x67b   :  { %v3292_v48 = vpop.f32.mrf.mxu1 }
 0x67c   :  { %v3278_v50 = vadd.f32 %v3277_v45, %v3265_v46 }
 0x67e   :  { %v3291_v52 = vadd.f32 %v3290_v21, %v3278_v50 }
 0x67f   :  { %v3253_v53 = vpop.f32.mrf.mxu3 }
 0x681   :  { %v3279_v27 = vpop.f32.mrf.mxu2 }
 0x683   :  { %v3316_v37 = vpop.f32.mrf.mxu0 }
 0x684   :  { %v3317_v5 = vadd.f32 %v3316_v37, %v2469_v2 }
 0x686   :  { %v3342_v51 = vpop.f32.mrf.mxu1 }
 0x687   :  { %v3303_v55 = vpop.f32.mrf.mxu3 }
 0x688   :  { %v3304_v58 = vadd.f32 %v3303_v55, %v3291_v52 }
 0x689   :  { %v3329_v23 = vpop.f32.mrf.mxu2 }
 0x68a   :  { %v6867_v15 = vmax.f32 %v3304_v58, 0.0  ;;  %v3330_v39 = vadd.f32 %v3329_v23, %v3317_v5 }
 0x68b   :  { %v3318_v11 = vpop.f32.mrf.mxu0 }
 0x68c   :  { %v3427_v62 = vsel %vm3426_vm12, %v6867_v15, 0.0  ;;  %v3443_v63 = vmul.f32 %v6867_v15, %v6867_v15  ;;  %v3343_v13 = vadd.f32 %v3342_v51, %v3330_v39 }
 0x68d   :  { %v3428_v3 = vrot.slane %v3427_v62, 4 }
 0x68e   :  { %v3344_v56 = vpop.f32.mrf.mxu1  ;;  %v3445_v4 = vsel %vm3426_vm12, %v3443_v63, 0.0 }
 0x68f   :  { %v3305_v57 = vpop.f32.mrf.mxu3  ;;  %v3429_v49 = vadd.f32 %v3428_v3, %v3427_v62  ;;  %v3446_v36 = vrot.slane %v3445_v4, 4 }
 0x691   :  { %v3331_v28 = vpop.f32.mrf.mxu2  ;;  %v3430_v8 = vrot.slane %v3429_v49, 2  ;;  %v3447_v10 = vadd.f32 %v3446_v36, %v3445_v4 }
 0x693   :  { %v3431_v19 = vadd.f32 %v3430_v8, %v3429_v49  ;;  %v3448_v20 = vrot.slane %v3447_v10, 2 }
 0x695   :  { %v3432_v25 = vrot.slane %v3431_v19, 1  ;;  %v3449_v29 = vadd.f32 %v3448_v20, %v3447_v10 }
 0x697   :  { %v3433_v33 = vadd.f32 %v3432_v25, %v3431_v19  ;;  %v3450_v26 = vrot.slane %v3449_v29, 1 }
 0x699   :  { %v6875_v9 = vmul.f32 0.5, %v3433_v33  ;;  %v3451_v34 = vadd.f32 %v3450_v26, %v3449_v29 }
 0x69b   :  { %v3459_v18 = vmul.f32 0.5, %v3451_v34  ;;  %v3461_v41 = vmul.f32 %v6875_v9, %v6875_v9 }
 0x69d   :  { %v3463_v22 = vsub.f32 %v3459_v18, %v3461_v41 }
 0x69f   :  { %v3465_v50 = vmax.f32 %v3463_v22, 0.0 }
 0x6a1   :  { %v3467_v51 = vadd.f32 1e-05, %v3465_v50 }
 0x6a3   :  { %v3368_v17 = vpop.f32.mrf.mxu0  ;;  %5181 = vrsqrt.f32 %v3467_v51  ;;  %vm3475_vm1 = vweird.f32 %v3467_v51 }
 0x6a4   :  { %v3394_v7 = vpop.f32.mrf.mxu1 }
 0x6a7   :  { %v3355_v60 = vpop.f32.mrf.mxu3 }
 0x6a8   :  { %v3356_v14 = vadd.f32 %v3355_v60, %v3343_v13 }
 0x6a9   :  { %v3381_v0 = vpop.f32.mrf.mxu2  ;;  %v5182_v60 = vpop.eup %5181 }
 0x6aa   :  { %v3369_v6 = vadd.f32 %v3368_v17, %v3356_v14  ;;  %v3470_v62 = vmul.f32 %v5182_v60, %v3467_v51  ;;  %vm3476_vm14 = vweird.f32 %v5182_v60 }
 0x6ab   :  { %v3370_v1 = vpop.f32.mrf.mxu0  ;;  %vm3477_vm2 = vmor %vm3475_vm1, %vm3476_vm14 }
 0x6ac   :  { %v3396_v54 = vpop.f32.mrf.mxu1  ;;  %v3382_v32 = vadd.f32 %v3381_v0, %v3369_v6  ;;  %v3471_v63 = vmul.f32 %v5182_v60, %v3470_v62 }
 0x6ae   :  { %v3395_v12 = vadd.f32 %v3394_v7, %v3382_v32  ;;  %v3472_v54 = vmul.f32 0.5, %v3471_v63 }
 0x6af   :  { %v3357_v43 = vpop.f32.mrf.mxu3 }
 0x6b0   :  { %v3473_v4 = vsub.f32 1.5, %v3472_v54 }
 0x6b1   :  { %v3383_v35 = vpop.f32.mrf.mxu2 }
 0x6b2   :  { %v3474_v49 = vmul.f32 %v5182_v60, %v3473_v4 }
 0x6b4   :  { %v3478_v8 = vsel %vm3477_vm2, %v5182_v60, %v3474_v49 }
 0x6c3   :  { %v3420_v30 = vpop.f32.mrf.mxu0 }
 0x6c7   :  { %v3407_v38 = vpop.f32.mrf.mxu3 }
 0x6c8   :  { %v3408_v16 = vadd.f32 %v3407_v38, %v3395_v12 }
 0x6ca   :  { %v3421_v24 = vadd.f32 %v3420_v30, %v3408_v16 }
 0x6cb   :  { %v3422_v40 = vpop.f32.mrf.mxu0 }
 0x6cc   :  { %v6879_v59 = vmax.f32 %v3421_v24, 0.0 }
 0x6ce   :  { %v3434_v42 = vsel %vm3426_vm12, %v6879_v59, 0.0  ;;  %v3444_v21 = vmul.f32 %v6879_v59, %v6879_v59 }
 0x6cf   :  { %v3435_v44 = vrot.slane %v3434_v42, 4  ;;  %v3409_v45 = vpop.f32.mrf.mxu3 }
 0x6d0   :  { %v3452_v46 = vsel %vm3426_vm12, %v3444_v21, 0.0 }
 0x6d1   :  { %v3436_v47 = vadd.f32 %v3435_v44, %v3434_v42  ;;  %v3453_v48 = vrot.slane %v3452_v46, 4 }
 0x6d3   :  { %v3437_v52 = vrot.slane %v3436_v47, 2  ;;  %v3454_v53 = vadd.f32 %v3453_v48, %v3452_v46 }
 0x6d5   :  { %v3438_v27 = vadd.f32 %v3437_v52, %v3436_v47  ;;  %v3455_v37 = vrot.slane %v3454_v53, 2 }
 0x6d7   :  { %v3439_v55 = vrot.slane %v3438_v27, 1  ;;  %v3456_v23 = vadd.f32 %v3455_v37, %v3454_v53 }
 0x6d9   :  { %v3440_v11 = vadd.f32 %v3439_v55, %v3438_v27  ;;  %v3457_v56 = vrot.slane %v3456_v23, 1 }
 0x6db   :  { %v3442_v57 = vmul.f32 0.5, %v3440_v11  ;;  %v3458_v28 = vadd.f32 %v3457_v56, %v3456_v23 }
 0x6dd   :  { %v3460_v58 = vmul.f32 0.5, %v3458_v28  ;;  %v3462_v17 = vmul.f32 %v3442_v57, %v3442_v57 }
 0x6df   :  { %v3464_v7 = vsub.f32 %v3460_v58, %v3462_v17 }
 0x6e1   :  { %v3466_v61 = vmax.f32 %v3464_v7, 0.0 }
 0x6e3   :  { %v3468_v0 = vadd.f32 1e-05, %v3466_v61 }
 0x6e5   :  { %5183 = vrsqrt.f32 %v3468_v0  ;;  %vm3485_vm15 = vweird.f32 %v3468_v0 }
 0x6eb   :  { %v5184_v1 = vpop.eup %5183 }
 0x6ec   :  { %v3480_v2 = vmul.f32 %v5184_v1, %v3468_v0  ;;  %vm3486_vm13 = vweird.f32 %v5184_v1 }
 0x6ed   :  { %vm3487_vm0 = vmor %vm3485_vm15, %vm3486_vm13 }
 0x6ee   :  { %v3481_v3 = vmul.f32 %v5184_v1, %v3480_v2 }
 0x6f0   :  { %v3482_v43 = vmul.f32 0.5, %v3481_v3 }
 0x6f2   :  { %v3483_v5 = vsub.f32 1.5, %v3482_v43 }
 0x6f4   :  { %v3484_v36 = vmul.f32 %v5184_v1, %v3483_v5 }
 0x6f6   :  { %v3488_v35 = vsel %vm3487_vm0, %v5184_v1, %v3484_v36 }
 0x6f7   :  { %v3491_v39 = vrot.slane %v3488_v35, 4 }
 0x6f9   :  { %v3492_v10 = vsel %vm2273_vm10, %v3478_v8, %v3491_v39 }
 0x6fa   :  { %v3493_v13 = vrot.slane %v3492_v10, 7 }
 0x6fc   :  { %v3495_v14 = vmul.f32 %v3493_v13, %v6864_v31 }
 0x6fe   :  { %v3497_v19 = vperm.slane %v3495_v14, 1  ;;  %v3498_v20 = vperm.slane %v3495_v14, 5 }
 0x700   :  { %v3506_v6 = vmul.f32 %v3498_v20, %v3442_v57  ;;  %v3505_v25 = vmul.f32 %v3497_v19, %v6875_v9  ;;  %v3502_v33 = vperm.slane %v3498_v20, 1  ;;  %v3501_v12 = vperm.slane %v3497_v19, 1 }
 0x702   :  { %v3509_v29 = vrot.slane %v3506_v6, 4  ;;  %v3504_v16 = vmul.f32 %v3502_v33, %v6879_v59  ;;  %v3503_v18 = vmul.f32 %v3501_v12, %v6867_v15 }
 0x704   :  { %v3510_v32 = vsel %vm2273_vm10, %v3505_v25, %v3509_v29 }
 0x705   :  { %v3511_v30 = vrot.slane %v3510_v32, 6 }
 0x707   :  { %v3513_v26 = vsub.f32 %v6864_v31, %v3511_v30 }
 0x709   :  { %v3515_v34 = vperm.slane %v3513_v26, 2  ;;  %v3516_v38 = vperm.slane %v3513_v26, 6 }
 0x70b   :  { %v3519_v24 = vperm.slane %v3515_v34, 2  ;;  %v3520_v40 = vperm.slane %v3516_v38, 2 }
 0x70d   :  { %v3522_v41 = vadd.f32 %v3520_v40, %v3504_v16  ;;  %v3521_v42 = vadd.f32 %v3519_v24, %v3503_v18 }
 0x70f   :  { %v3525_v21 = vrot.slane %v3522_v41, 6 }
 0x711   :  { %v3526_v9 = vsel %vm3426_vm12, %v3521_v42, %v3525_v21 }
 0x712   :  { %3528 = vst [vmem:[%s6909_s12] sm:$0xf] %v3526_v9 }

</bundles_post_ra>
